<compile_context>
chip_gen: v7x
topology: tpu7x:2x2x1
jax: 0.10.0
libtpu: 0.0.40
codegen_flags: <defaults>
</compile_context>

<pallas_src>
import functools
import numpy as np
import jax
import jax.numpy as jnp
from jax.experimental import pallas as pl
from jax.experimental.pallas import tpu as pltpu


_COMPILER_PARAMS = pltpu.CompilerParams(
    dimension_semantics=("arbitrary",),
    vmem_limit_bytes=32 * 1024 * 1024,   # explicit budget, safe on v7x (64 MiB)
)


def _spec2d(shape):
    return pl.BlockSpec(shape, lambda i: (0, 0))


# ----------------------------- Pallas kernels -------------------------------

def _conv1_kernel(w_ref, p_ref, b_ref, o_ref, *, use_bf16):
    """relu(W (F, C*9) @ patches^T (C*9, B*OH*OW) + b (F, 1))."""
    w = w_ref[...]
    p = p_ref[...]
    if use_bf16:
        w = w.astype(jnp.bfloat16)
        p = p.astype(jnp.bfloat16)
    y = jnp.dot(w, p, preferred_element_type=jnp.float32)
    o_ref[...] = jnp.maximum(y + b_ref[...], 0.0)


def pallas_conv1(w1m, patches_t, b1, use_bf16=False):
    F, K = w1m.shape
    _, M = patches_t.shape
    kernel = functools.partial(_conv1_kernel, use_bf16=use_bf16)
    return pl.pallas_call(
        kernel,
        out_shape=jax.ShapeDtypeStruct((F, M), jnp.float32),
        grid=(1,),
        in_specs=[
            _spec2d((F, K)),
            _spec2d((K, M)),
            _spec2d((F, 1)),
        ],
        out_specs=_spec2d((F, M)),
        compiler_params=_COMPILER_PARAMS,
    )(w1m, patches_t, b1)


def _fused_tail_kernel(p2_ref, w2_ref, b2_ref,
                       encw_ref, encb_ref, lng_ref, lnb_ref,
                       fc1w_ref, fc1b_ref, fc2w_ref, fc2b_ref,
                       wmu_ref, bmu_ref, wls_ref, bls_ref,
                       noise_ref,
                       mu_o, pi_o, lp_o, ls_o,
                       *, batch, n_sp, lsmin, lsmax, adim, use_bf16):
    """conv2 GEMM -> encoder fc -> LayerNorm -> trunk -> SAC head, in VMEM."""

    def mm(a, b):
        if use_bf16:  # bf16 MXU inputs, f32 accumulation (v6e/v7x fast path)
            a = a.astype(jnp.bfloat16)
            b = b.astype(jnp.bfloat16)
        return jnp.dot(a, b, preferred_element_type=jnp.float32)

    # ---- conv2 as GEMM + bias + ReLU; rows ordered (spatial pos, batch) ----
    h2 = jnp.maximum(mm(p2_ref[...], w2_ref[...]) + b2_ref[...], 0.0)
    nf = h2.shape[-1]

    # ---- encoder fc: per-spatial-position accumulation.  Because the
    # enc_fc weight rows were host-permuted to (spatial, filter) order, this
    # equals torch's  h.view(B, -1) @ W.T  without any in-kernel reshape. ----
    fdim = encw_ref.shape[-1]
    enc = jnp.zeros((batch, fdim), jnp.float32)
    for p in range(n_sp):
        enc = enc + mm(h2[p * batch:(p + 1) * batch, :],
                       encw_ref[p * nf:(p + 1) * nf, :])
    enc = enc + encb_ref[...]

    # ---- LayerNorm (eps = 1e-5, elementwise affine) ----
    mean = jnp.mean(enc, axis=-1, keepdims=True)
    xc = enc - mean
    var = jnp.mean(xc * xc, axis=-1, keepdims=True)
    h = xc * jax.lax.rsqrt(var + 1e-5) * lng_ref[...] + lnb_ref[...]

    # ---- trunk MLP (fc3 split host-side == .chunk(2, dim=-1)) ----
    h = jnp.maximum(mm(h, fc1w_ref[...]) + fc1b_ref[...], 0.0)
    h = jnp.maximum(mm(h, fc2w_ref[...]) + fc2b_ref[...], 0.0)
    mu = mm(h, wmu_ref[...]) + bmu_ref[...]
    ls_raw = mm(h, wls_ref[...]) + bls_ref[...]

    # ---- head: tanh-rescaled log_std, reparam sample, logprob, squash ----
    # (kept in f32: v5e has no bf16 VPU/EUP)
    log_std = jnp.tanh(ls_raw)
    log_std = lsmin + 0.5 * (lsmax - lsmin) * (log_std + 1.0)
    std = jnp.exp(log_std)
    noise = noise_ref[...]
    pi = mu + noise * std
    log_pi = jnp.sum(-0.5 * noise * noise - log_std, axis=-1, keepdims=True)
    log_pi = log_pi - 0.5 * np.log(2.0 * np.pi) * adim
    mu_t = jnp.tanh(mu)
    pi_t = jnp.tanh(pi)
    log_pi = log_pi - jnp.sum(
        jnp.log(jnp.maximum(1.0 - pi_t * pi_t, 0.0) + 1e-6),
        axis=-1, keepdims=True)
    mu_o[...] = mu_t
    pi_o[...] = pi_t
    lp_o[...] = log_pi
    ls_o[...] = log_std


def pallas_actor_tail(patches2, params, noise, log_std_min, log_std_max,
                      use_bf16=False):
    Msp, K2 = patches2.shape
    B, A = noise.shape
    n_sp = Msp // B
    nf = params["conv2_b"].shape[-1]
    feat = params["enc_fc_b"].shape[-1]
    hidden = params["fc1_b"].shape[-1]

    kernel = functools.partial(
        _fused_tail_kernel, batch=B, n_sp=n_sp,
        lsmin=float(log_std_min), lsmax=float(log_std_max), adim=A,
        use_bf16=use_bf16)

    return pl.pallas_call(
        kernel,
        out_shape=(
            jax.ShapeDtypeStruct((B, A), jnp.float32),   # mu
            jax.ShapeDtypeStruct((B, A), jnp.float32),   # pi
            jax.ShapeDtypeStruct((B, 1), jnp.float32),   # log_pi
            jax.ShapeDtypeStruct((B, A), jnp.float32),   # log_std
        ),
        grid=(1,),
        in_specs=[
            _spec2d((Msp, K2)),          # conv2 patches
            _spec2d((K2, nf)),           # conv2 weight (K, F)
            _spec2d((1, nf)),            # conv2 bias
            _spec2d((n_sp * nf, feat)),  # enc_fc weight, rows (spatial, filter)
            _spec2d((1, feat)),          # enc_fc bias
            _spec2d((1, feat)),          # ln gamma
            _spec2d((1, feat)),          # ln beta
            _spec2d((feat, hidden)),     # fc1 w
            _spec2d((1, hidden)),        # fc1 b
            _spec2d((hidden, hidden)),   # fc2 w
            _spec2d((1, hidden)),        # fc2 b
            _spec2d((hidden, A)),        # fc3 mu w
            _spec2d((1, A)),             # fc3 mu b
            _spec2d((hidden, A)),        # fc3 log_std w
            _spec2d((1, A)),             # fc3 log_std b
            _spec2d((B, A)),             # noise
        ],
        out_specs=(
            _spec2d((B, A)),
            _spec2d((B, A)),
            _spec2d((B, 1)),
            _spec2d((B, A)),
        ),
        compiler_params=_COMPILER_PARAMS,
    )(patches2, params["conv2_wt"], params["conv2_b"],
      params["enc_fc_w_perm"], params["enc_fc_b"],
      params["ln_g"], params["ln_b"],
      params["fc1_w"], params["fc1_b"],
      params["fc2_w"], params["fc2_b"],
      params["fc3_mu_w"], params["fc3_mu_b"],
      params["fc3_ls_w"], params["fc3_ls_b"],
      noise)


# ------------------------------ JAX glue ------------------------------------

def conv1_im2col_t(x, ksize, stride):
    """x: (B, C, H, W) -> transposed patches (C*k*k, B*oh*ow).

    Rows ordered (channel, ki, kj) to match torch weight.view(F, C*k*k);
    columns ordered (batch, out_row, out_col)."""
    B, C, H, W = x.shape
    oh = (H - ksize) // stride + 1
    ow = (W - ksize) // stride + 1
    taps = []
    for i in range(ksize):
        for j in range(ksize):
            taps.append(
                x[:, :, i:i + stride * oh:stride, j:j + stride * ow:stride])
    t = jnp.stack(taps, axis=2)              # (B, C, k*k, oh, ow)
    t = t.transpose(1, 2, 0, 3, 4)           # (C, k*k, B, oh, ow)
    return t.reshape(C * ksize * ksize, B * oh * ow), oh, ow


def conv2_patches(h1t, batch, nf, oh1, ksize):
    """h1t: (F, B*oh1*oh1) conv1 output (cols ordered (b, r, c)) ->
    stride-1 im2col patches (oh2*oh2*B, F*k*k), rows ordered
    (spatial position, batch), columns ordered (filter, ki, kj)."""
    oh2 = oh1 - ksize + 1
    h = h1t.reshape(nf, batch, oh1, oh1)
    taps = []
    for i in range(ksize):
        for j in range(ksize):
            taps.append(h[:, :, i:i + oh2, j:j + oh2])   # (F, B, oh2, oh2)
    t = jnp.stack(taps, axis=1)               # (F, k*k, B, oh2, oh2)
    t = t.transpose(3, 4, 2, 0, 1)            # (oh2, oh2, B, F, k*k)
    return t.reshape(oh2 * oh2 * batch, nf * ksize * ksize)


def actor_forward(params, obs, noise, log_std_min, log_std_max,
                  use_bf16=False):
    """Actor.forward with compute_pi=True, compute_log_pi=True."""
    B = obs.shape[0]
    nf = params["conv2_b"].shape[-1]

    # conv1 (3x3, stride 2) + ReLU as a Pallas GEMM; /255 folded into weights.
    p1t, oh1, _ = conv1_im2col_t(obs, 3, 2)
    h1t = pallas_conv1(params["conv1_w"], p1t, params["conv1_b"],
                       use_bf16=use_bf16)                 # (F, B*oh1*oh1)

    # TODO(synk): this stride-1 patch extraction could move in-kernel with
    # strided ref reads; kept as (jit-fused) XLA glue since the tensor is ~3KB.
    p2 = conv2_patches(h1t, B, nf, oh1, 3)

    # conv2 + encoder fc + LayerNorm + trunk + head in ONE fused Pallas kernel.
    return pallas_actor_tail(p2, params, noise, log_std_min, log_std_max,
                             use_bf16=use_bf16)


# --------------------------- parameter creation ------------------------------

def _orthogonal_np(rng, rows, cols, gain=1.0):
    a = rng.standard_normal((rows, cols)).astype(np.float64)
    flip = rows < cols
    if flip:
        a = a.T
    q, r = np.linalg.qr(a)
    q = q * np.sign(np.diag(r))
    if flip:
        q = q.T
    return (gain * q[:rows, :cols]).astype(np.float32)


def make_params(obs_channels, action_dim, hidden_dim, feature_dim, num_filters,
                img_hw):
    rng = np.random.RandomState(0)
    gain_relu = float(np.sqrt(2.0))
    C, F, A = obs_channels, num_filters, action_dim

    # conv weights: zero-filled, center tap orthogonal * gain('relu')
    w1 = np.zeros((F, C, 3, 3), np.float32)
    w1[:, :, 1, 1] = _orthogonal_np(rng, F, C, gain_relu)
    w2 = np.zeros((F, F, 3, 3), np.float32)
    w2[:, :, 1, 1] = _orthogonal_np(rng, F, F, gain_relu)

    oh1 = (img_hw - 3) // 2 + 1
    oh2 = oh1 - 3 + 1
    n_sp = oh2 * oh2
    flat = F * n_sp

    enc_fc_w = _orthogonal_np(rng, feature_dim, flat)          # (out, in)
    fc1_w = _orthogonal_np(rng, hidden_dim, feature_dim)
    fc2_w = _orthogonal_np(rng, hidden_dim, hidden_dim)
    fc3_w = _orthogonal_np(rng, 2 * A, hidden_dim)

    # Permute enc_fc rows from torch flatten order (filter, spatial) to
    # (spatial, filter) so the fused kernel needs no in-kernel reshape.
    enc_fc_w_perm = (enc_fc_w.reshape(feature_dim, F, n_sp)
                     .transpose(2, 1, 0).reshape(n_sp * F, feature_dim))

    def b(n):
        return jnp.zeros((1, n), jnp.float32)

    return {
        # conv1 as (F, C*9) with the 1/255 pixel preprocessing folded in
        "conv1_w": jnp.asarray(w1.reshape(F, C * 9) / np.float32(255.0)),
        "conv1_b": jnp.zeros((F, 1), jnp.float32),
        # conv2 as (F*9, F) = weight.view(F, F*9).T
        "conv2_wt": jnp.asarray(w2.reshape(F, F * 9).T),
        "conv2_b": b(F),
        "enc_fc_w_perm": jnp.asarray(enc_fc_w_perm),
        "enc_fc_b": b(feature_dim),
        "ln_g": jnp.ones((1, feature_dim), jnp.float32),
        "ln_b": jnp.zeros((1, feature_dim), jnp.float32),
        "fc1_w": jnp.asarray(fc1_w.T),
        "fc1_b": b(hidden_dim),
        "fc2_w": jnp.asarray(fc2_w.T),
        "fc2_b": b(hidden_dim),
        # fc3 split into mu / log_std halves == .chunk(2, dim=-1)
        "fc3_mu_w": jnp.asarray(fc3_w[:A].T),
        "fc3_mu_b": b(A),
        "fc3_ls_w": jnp.asarray(fc3_w[A:].T),
        "fc3_ls_b": b(A),
    }


# ---------------------------------- main -------------------------------------

if __name__ == "__main__":
    B, C, H, W = 2, 4, 16, 16            # small pixel observation
    action_dim = 4
    hidden_dim = 32
    encoder_feature_dim = 32
    num_filters = 8
    log_std_min, log_std_max = -10.0, 2.0

    params = make_params(C, action_dim, hidden_dim, encoder_feature_dim,
                         num_filters, img_hw=H)

    key = jax.random.PRNGKey(0)
    k_obs, k_noise = jax.random.split(key)
    obs = jax.random.uniform(k_obs, (B, C, H, W), jnp.float32, 0.0, 255.0)
    noise = jax.random.normal(k_noise, (B, action_dim), jnp.float32)

    fwd = jax.jit(actor_forward,
                  static_argnames=("log_std_min", "log_std_max", "use_bf16"))
    mu, pi, log_pi, log_std = fwd(params, obs, noise,
                                  log_std_min=log_std_min,
                                  log_std_max=log_std_max,
                                  use_bf16=False)
    jax.block_until_ready((mu, pi, log_pi, log_std))

    assert mu.shape == (B, action_dim)
    assert pi.shape == (B, action_dim)
    assert log_pi.shape == (B, 1)
    assert log_std.shape == (B, action_dim)
    assert bool(jnp.all(jnp.isfinite(mu)))
    assert bool(jnp.all(jnp.isfinite(pi)))
    assert bool(jnp.all(jnp.isfinite(log_pi)))
    assert bool(jnp.all(jnp.isfinite(log_std)))
    print("KERNEL_OK")
</pallas_src>

<mosaic_0001>
module attributes {stable_mosaic.version = 11 : i64} {
  func.func @_conv1_kernel(%arg0: i32, %arg1: memref<8x36xf32, #tpu.memory_space<vmem>>, %arg2: memref<36x98xf32, #tpu.memory_space<vmem>>, %arg3: memref<8x1xf32, #tpu.memory_space<vmem>>, %arg4: memref<8x98xf32, #tpu.memory_space<vmem>>) attributes {dimension_semantics = [#tpu.dimension_semantics<arbitrary>], iteration_bounds = array<i64: 1>, scalar_prefetch = 0 : i64, scratch_operands = 0 : i64, tpu.core_type = #tpu.core_type<tc>, window_params = [{pipeline_mode = #tpu.pipeline_mode<synchronous>, transform_indices = @transform_0, window_bounds = array<i64: 8, 36>}, {pipeline_mode = #tpu.pipeline_mode<synchronous>, transform_indices = @transform_1, window_bounds = array<i64: 36, 98>}, {pipeline_mode = #tpu.pipeline_mode<synchronous>, transform_indices = @transform_2, window_bounds = array<i64: 8, 1>}, {pipeline_mode = #tpu.pipeline_mode<synchronous>, transform_indices = @transform_3, window_bounds = array<i64: 8, 98>}]} {
    %c0 = arith.constant 0 : index
    %c0_0 = arith.constant 0 : index
    %0 = vector.load %arg1[%c0, %c0_0] : memref<8x36xf32, #tpu.memory_space<vmem>>, vector<8x36xf32>
    %c0_1 = arith.constant 0 : index
    %c0_2 = arith.constant 0 : index
    %1 = vector.load %arg2[%c0_1, %c0_2] : memref<36x98xf32, #tpu.memory_space<vmem>>, vector<36x98xf32>
    %cst = arith.constant dense<0.000000e+00> : vector<8x98xf32>
    %2 = tpu.matmul %0, %1, %cst {dimension_numbers = #tpu.dot_dimension_numbers<[1], [0], [0], [1], [0, 0, 1, 1], [], []>} : vector<8x36xf32>, vector<36x98xf32>, vector<8x98xf32> -> vector<8x98xf32>
    %c0_3 = arith.constant 0 : index
    %c0_4 = arith.constant 0 : index
    %3 = vector.load %arg3[%c0_3, %c0_4] : memref<8x1xf32, #tpu.memory_space<vmem>>, vector<8x1xf32>
    %4 = vector.broadcast %3 : vector<8x1xf32> to vector<8x98xf32>
    %5 = arith.addf %2, %4 : vector<8x98xf32>
    %cst_5 = arith.constant 0.000000e+00 : f32
    %6 = vector.broadcast %cst_5 : f32 to vector<8x98xf32>
    %7 = arith.maximumf %5, %6 : vector<8x98xf32>
    %c0_6 = arith.constant 0 : index
    %c0_7 = arith.constant 0 : index
    %8 = vector.load %arg4[%c0_6, %c0_7] : memref<8x98xf32, #tpu.memory_space<vmem>>, vector<8x98xf32>
    tpu.vector_store %arg4[%c0_6, %c0_7], %7 {strides = array<i32>} : memref<8x98xf32, #tpu.memory_space<vmem>>, vector<8x98xf32>,
    return
  }
  func.func @transform_0(%arg0: i32) -> (i32, i32) {
    %c0_i32 = arith.constant 0 : i32
    %c0_i32_0 = arith.constant 0 : i32
    %c0_i32_1 = arith.constant 0 : i32
    return %c0_i32, %c0_i32_0 : i32, i32
  }
  func.func @transform_1(%arg0: i32) -> (i32, i32) {
    %c0_i32 = arith.constant 0 : i32
    %c0_i32_0 = arith.constant 0 : i32
    %c0_i32_1 = arith.constant 0 : i32
    return %c0_i32, %c0_i32_0 : i32, i32
  }
  func.func @transform_2(%arg0: i32) -> (i32, i32) {
    %c0_i32 = arith.constant 0 : i32
    %c0_i32_0 = arith.constant 0 : i32
    %c0_i32_1 = arith.constant 0 : i32
    return %c0_i32, %c0_i32_0 : i32, i32
  }
  func.func @transform_3(%arg0: i32) -> (i32, i32) {
    %c0_i32 = arith.constant 0 : i32
    %c0_i32_0 = arith.constant 0 : i32
    %c0_i32_1 = arith.constant 0 : i32
    return %c0_i32, %c0_i32_0 : i32, i32
  }
}

module attributes {stable_mosaic.version = 11 : i64} {
  func.func @_fused_tail_kernel(%arg0: i32, %arg1: memref<50x72xf32, #tpu.memory_space<vmem>>, %arg2: memref<72x8xf32, #tpu.memory_space<vmem>>, %arg3: memref<1x8xf32, #tpu.memory_space<vmem>>, %arg4: memref<200x32xf32, #tpu.memory_space<vmem>>, %arg5: memref<1x32xf32, #tpu.memory_space<vmem>>, %arg6: memref<1x32xf32, #tpu.memory_space<vmem>>, %arg7: memref<1x32xf32, #tpu.memory_space<vmem>>, %arg8: memref<32x32xf32, #tpu.memory_space<vmem>>, %arg9: memref<1x32xf32, #tpu.memory_space<vmem>>, %arg10: memref<32x32xf32, #tpu.memory_space<vmem>>, %arg11: memref<1x32xf32, #tpu.memory_space<vmem>>, %arg12: memref<32x4xf32, #tpu.memory_space<vmem>>, %arg13: memref<1x4xf32, #tpu.memory_space<vmem>>, %arg14: memref<32x4xf32, #tpu.memory_space<vmem>>, %arg15: memref<1x4xf32, #tpu.memory_space<vmem>>, %arg16: memref<2x4xf32, #tpu.memory_space<vmem>>, %arg17: memref<2x4xf32, #tpu.memory_space<vmem>>, %arg18: memref<2x4xf32, #tpu.memory_space<vmem>>, %arg19: memref<2x1xf32, #tpu.memory_space<vmem>>, %arg20: memref<2x4xf32, #tpu.memory_space<vmem>>) attributes {dimension_semantics = [#tpu.dimension_semantics<arbitrary>], iteration_bounds = array<i64: 1>, scalar_prefetch = 0 : i64, scratch_operands = 0 : i64, tpu.core_type = #tpu.core_type<tc>, window_params = [{pipeline_mode = #tpu.pipeline_mode<synchronous>, transform_indices = @transform_0, window_bounds = array<i64: 50, 72>}, {pipeline_mode = #tpu.pipeline_mode<synchronous>, transform_indices = @transform_1, window_bounds = array<i64: 72, 8>}, {pipeline_mode = #tpu.pipeline_mode<synchronous>, transform_indices = @transform_2, window_bounds = array<i64: 1, 8>}, {pipeline_mode = #tpu.pipeline_mode<synchronous>, transform_indices = @transform_3, window_bounds = array<i64: 200, 32>}, {pipeline_mode = #tpu.pipeline_mode<synchronous>, transform_indices = @transform_4, window_bounds = array<i64: 1, 32>}, {pipeline_mode = #tpu.pipeline_mode<synchronous>, transform_indices = @transform_5, window_bounds = array<i64: 1, 32>}, {pipeline_mode = #tpu.pipeline_mode<synchronous>, transform_indices = @transform_6, window_bounds = array<i64: 1, 32>}, {pipeline_mode = #tpu.pipeline_mode<synchronous>, transform_indices = @transform_7, window_bounds = array<i64: 32, 32>}, {pipeline_mode = #tpu.pipeline_mode<synchronous>, transform_indices = @transform_8, window_bounds = array<i64: 1, 32>}, {pipeline_mode = #tpu.pipeline_mode<synchronous>, transform_indices = @transform_9, window_bounds = array<i64: 32, 32>}, {pipeline_mode = #tpu.pipeline_mode<synchronous>, transform_indices = @transform_10, window_bounds = array<i64: 1, 32>}, {pipeline_mode = #tpu.pipeline_mode<synchronous>, transform_indices = @transform_11, window_bounds = array<i64: 32, 4>}, {pipeline_mode = #tpu.pipeline_mode<synchronous>, transform_indices = @transform_12, window_bounds = array<i64: 1, 4>}, {pipeline_mode = #tpu.pipeline_mode<synchronous>, transform_indices = @transform_13, window_bounds = array<i64: 32, 4>}, {pipeline_mode = #tpu.pipeline_mode<synchronous>, transform_indices = @transform_14, window_bounds = array<i64: 1, 4>}, {pipeline_mode = #tpu.pipeline_mode<synchronous>, transform_indices = @transform_15, window_bounds = array<i64: 2, 4>}, {pipeline_mode = #tpu.pipeline_mode<synchronous>, transform_indices = @transform_16, window_bounds = array<i64: 2, 4>}, {pipeline_mode = #tpu.pipeline_mode<synchronous>, transform_indices = @transform_17, window_bounds = array<i64: 2, 4>}, {pipeline_mode = #tpu.pipeline_mode<synchronous>, transform_indices = @transform_18, window_bounds = array<i64: 2, 1>}, {pipeline_mode = #tpu.pipeline_mode<synchronous>, transform_indices = @transform_19, window_bounds = array<i64: 2, 4>}]} {
    %c0 = arith.constant 0 : index
    %c0_0 = arith.constant 0 : index
    %0 = vector.load %arg1[%c0, %c0_0] : memref<50x72xf32, #tpu.memory_space<vmem>>, vector<50x72xf32>
    %c0_1 = arith.constant 0 : index
    %c0_2 = arith.constant 0 : index
    %1 = vector.load %arg2[%c0_1, %c0_2] : memref<72x8xf32, #tpu.memory_space<vmem>>, vector<72x8xf32>
    %cst = arith.constant dense<0.000000e+00> : vector<50x8xf32>
    %2 = tpu.matmul %0, %1, %cst {dimension_numbers = #tpu.dot_dimension_numbers<[1], [0], [0], [1], [0, 0, 1, 1], [], []>} : vector<50x72xf32>, vector<72x8xf32>, vector<50x8xf32> -> vector<50x8xf32>
    %c0_3 = arith.constant 0 : index
    %c0_4 = arith.constant 0 : index
    %3 = vector.load %arg3[%c0_3, %c0_4] : memref<1x8xf32, #tpu.memory_space<vmem>>, vector<1x8xf32>
    %4 = vector.broadcast %3 : vector<1x8xf32> to vector<50x8xf32>
    %5 = arith.addf %2, %4 : vector<50x8xf32>
    %cst_5 = arith.constant 0.000000e+00 : f32
    %6 = vector.broadcast %cst_5 : f32 to vector<50x8xf32>
    %7 = arith.maximumf %5, %6 : vector<50x8xf32>
    %cst_6 = arith.constant 0.000000e+00 : f32
    %8 = vector.broadcast %cst_6 : f32 to vector<2x32xf32>
    %9 = vector.extract_strided_slice %7 {offsets = [0, 0], sizes = [2, 8], strides = [1, 1]} : vector<50x8xf32> to vector<2x8xf32>
    %c0_7 = arith.constant 0 : index
    %c0_8 = arith.constant 0 : index
    %10 = vector.load %arg4[%c0_7, %c0_8] : memref<200x32xf32, #tpu.memory_space<vmem>>, vector<8x32xf32>
    %cst_9 = arith.constant dense<0.000000e+00> : vector<2x32xf32>
    %11 = tpu.matmul %9, %10, %cst_9 {dimension_numbers = #tpu.dot_dimension_numbers<[1], [0], [0], [1], [0, 0, 1, 1], [], []>} : vector<2x8xf32>, vector<8x32xf32>, vector<2x32xf32> -> vector<2x32xf32>
    %12 = arith.addf %8, %11 : vector<2x32xf32>
    %13 = vector.extract_strided_slice %7 {offsets = [2, 0], sizes = [2, 8], strides = [1, 1]} : vector<50x8xf32> to vector<2x8xf32>
    %c8 = arith.constant 8 : index
    %c0_10 = arith.constant 0 : index
    %14 = vector.load %arg4[%c8, %c0_10] : memref<200x32xf32, #tpu.memory_space<vmem>>, vector<8x32xf32>
    %cst_11 = arith.constant dense<0.000000e+00> : vector<2x32xf32>
    %15 = tpu.matmul %13, %14, %cst_11 {dimension_numbers = #tpu.dot_dimension_numbers<[1], [0], [0], [1], [0, 0, 1, 1], [], []>} : vector<2x8xf32>, vector<8x32xf32>, vector<2x32xf32> -> vector<2x32xf32>
    %16 = arith.addf %12, %15 : vector<2x32xf32>
    %17 = vector.extract_strided_slice %7 {offsets = [4, 0], sizes = [2, 8], strides = [1, 1]} : vector<50x8xf32> to vector<2x8xf32>
    %c16 = arith.constant 16 : index
    %c0_12 = arith.constant 0 : index
    %18 = vector.load %arg4[%c16, %c0_12] : memref<200x32xf32, #tpu.memory_space<vmem>>, vector<8x32xf32>
    %cst_13 = arith.constant dense<0.000000e+00> : vector<2x32xf32>
    %19 = tpu.matmul %17, %18, %cst_13 {dimension_numbers = #tpu.dot_dimension_numbers<[1], [0], [0], [1], [0, 0, 1, 1], [], []>} : vector<2x8xf32>, vector<8x32xf32>, vector<2x32xf32> -> vector<2x32xf32>
    %20 = arith.addf %16, %19 : vector<2x32xf32>
    %21 = vector.extract_strided_slice %7 {offsets = [6, 0], sizes = [2, 8], strides = [1, 1]} : vector<50x8xf32> to vector<2x8xf32>
    %c24 = arith.constant 24 : index
    %c0_14 = arith.constant 0 : index
    %22 = vector.load %arg4[%c24, %c0_14] : memref<200x32xf32, #tpu.memory_space<vmem>>, vector<8x32xf32>
    %cst_15 = arith.constant dense<0.000000e+00> : vector<2x32xf32>
    %23 = tpu.matmul %21, %22, %cst_15 {dimension_numbers = #tpu.dot_dimension_numbers<[1], [0], [0], [1], [0, 0, 1, 1], [], []>} : vector<2x8xf32>, vector<8x32xf32>, vector<2x32xf32> -> vector<2x32xf32>
    %24 = arith.addf %20, %23 : vector<2x32xf32>
    %25 = vector.extract_strided_slice %7 {offsets = [8, 0], sizes = [2, 8], strides = [1, 1]} : vector<50x8xf32> to vector<2x8xf32>
    %c32 = arith.constant 32 : index
    %c0_16 = arith.constant 0 : index
    %26 = vector.load %arg4[%c32, %c0_16] : memref<200x32xf32, #tpu.memory_space<vmem>>, vector<8x32xf32>
    %cst_17 = arith.constant dense<0.000000e+00> : vector<2x32xf32>
    %27 = tpu.matmul %25, %26, %cst_17 {dimension_numbers = #tpu.dot_dimension_numbers<[1], [0], [0], [1], [0, 0, 1, 1], [], []>} : vector<2x8xf32>, vector<8x32xf32>, vector<2x32xf32> -> vector<2x32xf32>
    %28 = arith.addf %24, %27 : vector<2x32xf32>
    %29 = vector.extract_strided_slice %7 {offsets = [10, 0], sizes = [2, 8], strides = [1, 1]} : vector<50x8xf32> to vector<2x8xf32>
    %c40 = arith.constant 40 : index
    %c0_18 = arith.constant 0 : index
    %30 = vector.load %arg4[%c40, %c0_18] : memref<200x32xf32, #tpu.memory_space<vmem>>, vector<8x32xf32>
    %cst_19 = arith.constant dense<0.000000e+00> : vector<2x32xf32>
    %31 = tpu.matmul %29, %30, %cst_19 {dimension_numbers = #tpu.dot_dimension_numbers<[1], [0], [0], [1], [0, 0, 1, 1], [], []>} : vector<2x8xf32>, vector<8x32xf32>, vector<2x32xf32> -> vector<2x32xf32>
    %32 = arith.addf %28, %31 : vector<2x32xf32>
    %33 = vector.extract_strided_slice %7 {offsets = [12, 0], sizes = [2, 8], strides = [1, 1]} : vector<50x8xf32> to vector<2x8xf32>
    %c48 = arith.constant 48 : index
    %c0_20 = arith.constant 0 : index
    %34 = vector.load %arg4[%c48, %c0_20] : memref<200x32xf32, #tpu.memory_space<vmem>>, vector<8x32xf32>
    %cst_21 = arith.constant dense<0.000000e+00> : vector<2x32xf32>
    %35 = tpu.matmul %33, %34, %cst_21 {dimension_numbers = #tpu.dot_dimension_numbers<[1], [0], [0], [1], [0, 0, 1, 1], [], []>} : vector<2x8xf32>, vector<8x32xf32>, vector<2x32xf32> -> vector<2x32xf32>
    %36 = arith.addf %32, %35 : vector<2x32xf32>
    %37 = vector.extract_strided_slice %7 {offsets = [14, 0], sizes = [2, 8], strides = [1, 1]} : vector<50x8xf32> to vector<2x8xf32>
    %c56 = arith.constant 56 : index
    %c0_22 = arith.constant 0 : index
    %38 = vector.load %arg4[%c56, %c0_22] : memref<200x32xf32, #tpu.memory_space<vmem>>, vector<8x32xf32>
    %cst_23 = arith.constant dense<0.000000e+00> : vector<2x32xf32>
    %39 = tpu.matmul %37, %38, %cst_23 {dimension_numbers = #tpu.dot_dimension_numbers<[1], [0], [0], [1], [0, 0, 1, 1], [], []>} : vector<2x8xf32>, vector<8x32xf32>, vector<2x32xf32> -> vector<2x32xf32>
    %40 = arith.addf %36, %39 : vector<2x32xf32>
    %41 = vector.extract_strided_slice %7 {offsets = [16, 0], sizes = [2, 8], strides = [1, 1]} : vector<50x8xf32> to vector<2x8xf32>
    %c64 = arith.constant 64 : index
    %c0_24 = arith.constant 0 : index
    %42 = vector.load %arg4[%c64, %c0_24] : memref<200x32xf32, #tpu.memory_space<vmem>>, vector<8x32xf32>
    %cst_25 = arith.constant dense<0.000000e+00> : vector<2x32xf32>
    %43 = tpu.matmul %41, %42, %cst_25 {dimension_numbers = #tpu.dot_dimension_numbers<[1], [0], [0], [1], [0, 0, 1, 1], [], []>} : vector<2x8xf32>, vector<8x32xf32>, vector<2x32xf32> -> vector<2x32xf32>
    %44 = arith.addf %40, %43 : vector<2x32xf32>
    %45 = vector.extract_strided_slice %7 {offsets = [18, 0], sizes = [2, 8], strides = [1, 1]} : vector<50x8xf32> to vector<2x8xf32>
    %c72 = arith.constant 72 : index
    %c0_26 = arith.constant 0 : index
    %46 = vector.load %arg4[%c72, %c0_26] : memref<200x32xf32, #tpu.memory_space<vmem>>, vector<8x32xf32>
    %cst_27 = arith.constant dense<0.000000e+00> : vector<2x32xf32>
    %47 = tpu.matmul %45, %46, %cst_27 {dimension_numbers = #tpu.dot_dimension_numbers<[1], [0], [0], [1], [0, 0, 1, 1], [], []>} : vector<2x8xf32>, vector<8x32xf32>, vector<2x32xf32> -> vector<2x32xf32>
    %48 = arith.addf %44, %47 : vector<2x32xf32>
    %49 = vector.extract_strided_slice %7 {offsets = [20, 0], sizes = [2, 8], strides = [1, 1]} : vector<50x8xf32> to vector<2x8xf32>
    %c80 = arith.constant 80 : index
    %c0_28 = arith.constant 0 : index
    %50 = vector.load %arg4[%c80, %c0_28] : memref<200x32xf32, #tpu.memory_space<vmem>>, vector<8x32xf32>
    %cst_29 = arith.constant dense<0.000000e+00> : vector<2x32xf32>
    %51 = tpu.matmul %49, %50, %cst_29 {dimension_numbers = #tpu.dot_dimension_numbers<[1], [0], [0], [1], [0, 0, 1, 1], [], []>} : vector<2x8xf32>, vector<8x32xf32>, vector<2x32xf32> -> vector<2x32xf32>
    %52 = arith.addf %48, %51 : vector<2x32xf32>
    %53 = vector.extract_strided_slice %7 {offsets = [22, 0], sizes = [2, 8], strides = [1, 1]} : vector<50x8xf32> to vector<2x8xf32>
    %c88 = arith.constant 88 : index
    %c0_30 = arith.constant 0 : index
    %54 = vector.load %arg4[%c88, %c0_30] : memref<200x32xf32, #tpu.memory_space<vmem>>, vector<8x32xf32>
    %cst_31 = arith.constant dense<0.000000e+00> : vector<2x32xf32>
    %55 = tpu.matmul %53, %54, %cst_31 {dimension_numbers = #tpu.dot_dimension_numbers<[1], [0], [0], [1], [0, 0, 1, 1], [], []>} : vector<2x8xf32>, vector<8x32xf32>, vector<2x32xf32> -> vector<2x32xf32>
    %56 = arith.addf %52, %55 : vector<2x32xf32>
    %57 = vector.extract_strided_slice %7 {offsets = [24, 0], sizes = [2, 8], strides = [1, 1]} : vector<50x8xf32> to vector<2x8xf32>
    %c96 = arith.constant 96 : index
    %c0_32 = arith.constant 0 : index
    %58 = vector.load %arg4[%c96, %c0_32] : memref<200x32xf32, #tpu.memory_space<vmem>>, vector<8x32xf32>
    %cst_33 = arith.constant dense<0.000000e+00> : vector<2x32xf32>
    %59 = tpu.matmul %57, %58, %cst_33 {dimension_numbers = #tpu.dot_dimension_numbers<[1], [0], [0], [1], [0, 0, 1, 1], [], []>} : vector<2x8xf32>, vector<8x32xf32>, vector<2x32xf32> -> vector<2x32xf32>
    %60 = arith.addf %56, %59 : vector<2x32xf32>
    %61 = vector.extract_strided_slice %7 {offsets = [26, 0], sizes = [2, 8], strides = [1, 1]} : vector<50x8xf32> to vector<2x8xf32>
    %c104 = arith.constant 104 : index
    %c0_34 = arith.constant 0 : index
    %62 = vector.load %arg4[%c104, %c0_34] : memref<200x32xf32, #tpu.memory_space<vmem>>, vector<8x32xf32>
    %cst_35 = arith.constant dense<0.000000e+00> : vector<2x32xf32>
    %63 = tpu.matmul %61, %62, %cst_35 {dimension_numbers = #tpu.dot_dimension_numbers<[1], [0], [0], [1], [0, 0, 1, 1], [], []>} : vector<2x8xf32>, vector<8x32xf32>, vector<2x32xf32> -> vector<2x32xf32>
    %64 = arith.addf %60, %63 : vector<2x32xf32>
    %65 = vector.extract_strided_slice %7 {offsets = [28, 0], sizes = [2, 8], strides = [1, 1]} : vector<50x8xf32> to vector<2x8xf32>
    %c112 = arith.constant 112 : index
    %c0_36 = arith.constant 0 : index
    %66 = vector.load %arg4[%c112, %c0_36] : memref<200x32xf32, #tpu.memory_space<vmem>>, vector<8x32xf32>
    %cst_37 = arith.constant dense<0.000000e+00> : vector<2x32xf32>
    %67 = tpu.matmul %65, %66, %cst_37 {dimension_numbers = #tpu.dot_dimension_numbers<[1], [0], [0], [1], [0, 0, 1, 1], [], []>} : vector<2x8xf32>, vector<8x32xf32>, vector<2x32xf32> -> vector<2x32xf32>
    %68 = arith.addf %64, %67 : vector<2x32xf32>
    %69 = vector.extract_strided_slice %7 {offsets = [30, 0], sizes = [2, 8], strides = [1, 1]} : vector<50x8xf32> to vector<2x8xf32>
    %c120 = arith.constant 120 : index
    %c0_38 = arith.constant 0 : index
    %70 = vector.load %arg4[%c120, %c0_38] : memref<200x32xf32, #tpu.memory_space<vmem>>, vector<8x32xf32>
    %cst_39 = arith.constant dense<0.000000e+00> : vector<2x32xf32>
    %71 = tpu.matmul %69, %70, %cst_39 {dimension_numbers = #tpu.dot_dimension_numbers<[1], [0], [0], [1], [0, 0, 1, 1], [], []>} : vector<2x8xf32>, vector<8x32xf32>, vector<2x32xf32> -> vector<2x32xf32>
    %72 = arith.addf %68, %71 : vector<2x32xf32>
    %73 = vector.extract_strided_slice %7 {offsets = [32, 0], sizes = [2, 8], strides = [1, 1]} : vector<50x8xf32> to vector<2x8xf32>
    %c128 = arith.constant 128 : index
    %c0_40 = arith.constant 0 : index
    %74 = vector.load %arg4[%c128, %c0_40] : memref<200x32xf32, #tpu.memory_space<vmem>>, vector<8x32xf32>
    %cst_41 = arith.constant dense<0.000000e+00> : vector<2x32xf32>
    %75 = tpu.matmul %73, %74, %cst_41 {dimension_numbers = #tpu.dot_dimension_numbers<[1], [0], [0], [1], [0, 0, 1, 1], [], []>} : vector<2x8xf32>, vector<8x32xf32>, vector<2x32xf32> -> vector<2x32xf32>
    %76 = arith.addf %72, %75 : vector<2x32xf32>
    %77 = vector.extract_strided_slice %7 {offsets = [34, 0], sizes = [2, 8], strides = [1, 1]} : vector<50x8xf32> to vector<2x8xf32>
    %c136 = arith.constant 136 : index
    %c0_42 = arith.constant 0 : index
    %78 = vector.load %arg4[%c136, %c0_42] : memref<200x32xf32, #tpu.memory_space<vmem>>, vector<8x32xf32>
    %cst_43 = arith.constant dense<0.000000e+00> : vector<2x32xf32>
    %79 = tpu.matmul %77, %78, %cst_43 {dimension_numbers = #tpu.dot_dimension_numbers<[1], [0], [0], [1], [0, 0, 1, 1], [], []>} : vector<2x8xf32>, vector<8x32xf32>, vector<2x32xf32> -> vector<2x32xf32>
    %80 = arith.addf %76, %79 : vector<2x32xf32>
    %81 = vector.extract_strided_slice %7 {offsets = [36, 0], sizes = [2, 8], strides = [1, 1]} : vector<50x8xf32> to vector<2x8xf32>
    %c144 = arith.constant 144 : index
    %c0_44 = arith.constant 0 : index
    %82 = vector.load %arg4[%c144, %c0_44] : memref<200x32xf32, #tpu.memory_space<vmem>>, vector<8x32xf32>
    %cst_45 = arith.constant dense<0.000000e+00> : vector<2x32xf32>
    %83 = tpu.matmul %81, %82, %cst_45 {dimension_numbers = #tpu.dot_dimension_numbers<[1], [0], [0], [1], [0, 0, 1, 1], [], []>} : vector<2x8xf32>, vector<8x32xf32>, vector<2x32xf32> -> vector<2x32xf32>
    %84 = arith.addf %80, %83 : vector<2x32xf32>
    %85 = vector.extract_strided_slice %7 {offsets = [38, 0], sizes = [2, 8], strides = [1, 1]} : vector<50x8xf32> to vector<2x8xf32>
    %c152 = arith.constant 152 : index
    %c0_46 = arith.constant 0 : index
    %86 = vector.load %arg4[%c152, %c0_46] : memref<200x32xf32, #tpu.memory_space<vmem>>, vector<8x32xf32>
    %cst_47 = arith.constant dense<0.000000e+00> : vector<2x32xf32>
    %87 = tpu.matmul %85, %86, %cst_47 {dimension_numbers = #tpu.dot_dimension_numbers<[1], [0], [0], [1], [0, 0, 1, 1], [], []>} : vector<2x8xf32>, vector<8x32xf32>, vector<2x32xf32> -> vector<2x32xf32>
    %88 = arith.addf %84, %87 : vector<2x32xf32>
    %89 = vector.extract_strided_slice %7 {offsets = [40, 0], sizes = [2, 8], strides = [1, 1]} : vector<50x8xf32> to vector<2x8xf32>
    %c160 = arith.constant 160 : index
    %c0_48 = arith.constant 0 : index
    %90 = vector.load %arg4[%c160, %c0_48] : memref<200x32xf32, #tpu.memory_space<vmem>>, vector<8x32xf32>
    %cst_49 = arith.constant dense<0.000000e+00> : vector<2x32xf32>
    %91 = tpu.matmul %89, %90, %cst_49 {dimension_numbers = #tpu.dot_dimension_numbers<[1], [0], [0], [1], [0, 0, 1, 1], [], []>} : vector<2x8xf32>, vector<8x32xf32>, vector<2x32xf32> -> vector<2x32xf32>
    %92 = arith.addf %88, %91 : vector<2x32xf32>
    %93 = vector.extract_strided_slice %7 {offsets = [42, 0], sizes = [2, 8], strides = [1, 1]} : vector<50x8xf32> to vector<2x8xf32>
    %c168 = arith.constant 168 : index
    %c0_50 = arith.constant 0 : index
    %94 = vector.load %arg4[%c168, %c0_50] : memref<200x32xf32, #tpu.memory_space<vmem>>, vector<8x32xf32>
    %cst_51 = arith.constant dense<0.000000e+00> : vector<2x32xf32>
    %95 = tpu.matmul %93, %94, %cst_51 {dimension_numbers = #tpu.dot_dimension_numbers<[1], [0], [0], [1], [0, 0, 1, 1], [], []>} : vector<2x8xf32>, vector<8x32xf32>, vector<2x32xf32> -> vector<2x32xf32>
    %96 = arith.addf %92, %95 : vector<2x32xf32>
    %97 = vector.extract_strided_slice %7 {offsets = [44, 0], sizes = [2, 8], strides = [1, 1]} : vector<50x8xf32> to vector<2x8xf32>
    %c176 = arith.constant 176 : index
    %c0_52 = arith.constant 0 : index
    %98 = vector.load %arg4[%c176, %c0_52] : memref<200x32xf32, #tpu.memory_space<vmem>>, vector<8x32xf32>
    %cst_53 = arith.constant dense<0.000000e+00> : vector<2x32xf32>
    %99 = tpu.matmul %97, %98, %cst_53 {dimension_numbers = #tpu.dot_dimension_numbers<[1], [0], [0], [1], [0, 0, 1, 1], [], []>} : vector<2x8xf32>, vector<8x32xf32>, vector<2x32xf32> -> vector<2x32xf32>
    %100 = arith.addf %96, %99 : vector<2x32xf32>
    %101 = vector.extract_strided_slice %7 {offsets = [46, 0], sizes = [2, 8], strides = [1, 1]} : vector<50x8xf32> to vector<2x8xf32>
    %c184 = arith.constant 184 : index
    %c0_54 = arith.constant 0 : index
    %102 = vector.load %arg4[%c184, %c0_54] : memref<200x32xf32, #tpu.memory_space<vmem>>, vector<8x32xf32>
    %cst_55 = arith.constant dense<0.000000e+00> : vector<2x32xf32>
    %103 = tpu.matmul %101, %102, %cst_55 {dimension_numbers = #tpu.dot_dimension_numbers<[1], [0], [0], [1], [0, 0, 1, 1], [], []>} : vector<2x8xf32>, vector<8x32xf32>, vector<2x32xf32> -> vector<2x32xf32>
    %104 = arith.addf %100, %103 : vector<2x32xf32>
    %105 = vector.extract_strided_slice %7 {offsets = [48, 0], sizes = [2, 8], strides = [1, 1]} : vector<50x8xf32> to vector<2x8xf32>
    %c192 = arith.constant 192 : index
    %c0_56 = arith.constant 0 : index
    %106 = vector.load %arg4[%c192, %c0_56] : memref<200x32xf32, #tpu.memory_space<vmem>>, vector<8x32xf32>
    %cst_57 = arith.constant dense<0.000000e+00> : vector<2x32xf32>
    %107 = tpu.matmul %105, %106, %cst_57 {dimension_numbers = #tpu.dot_dimension_numbers<[1], [0], [0], [1], [0, 0, 1, 1], [], []>} : vector<2x8xf32>, vector<8x32xf32>, vector<2x32xf32> -> vector<2x32xf32>
    %108 = arith.addf %104, %107 : vector<2x32xf32>
    %c0_58 = arith.constant 0 : index
    %c0_59 = arith.constant 0 : index
    %109 = vector.load %arg5[%c0_58, %c0_59] : memref<1x32xf32, #tpu.memory_space<vmem>>, vector<1x32xf32>
    %110 = vector.broadcast %109 : vector<1x32xf32> to vector<2x32xf32>
    %111 = arith.addf %108, %110 : vector<2x32xf32>
    %cst_60 = arith.constant dense<0.000000e+00> : vector<2xf32>
    %112 = vector.multi_reduction <add>, %111, %cst_60 [1] : vector<2x32xf32> to vector<2xf32>
    %113 = vector.shape_cast %112 : vector<2xf32> to vector<2x1xf32>
    %cst_61 = arith.constant 3.200000e+01 : f32
    %114 = vector.broadcast %cst_61 : f32 to vector<2x1xf32>
    %115 = arith.divf %113, %114 : vector<2x1xf32>
    %116 = vector.broadcast %115 : vector<2x1xf32> to vector<2x32xf32>
    %117 = arith.subf %111, %116 : vector<2x32xf32>
    %118 = arith.mulf %117, %117 : vector<2x32xf32>
    %cst_62 = arith.constant dense<0.000000e+00> : vector<2xf32>
    %119 = vector.multi_reduction <add>, %118, %cst_62 [1] : vector<2x32xf32> to vector<2xf32>
    %120 = vector.shape_cast %119 : vector<2xf32> to vector<2x1xf32>
    %cst_63 = arith.constant 3.200000e+01 : f32
    %121 = vector.broadcast %cst_63 : f32 to vector<2x1xf32>
    %122 = arith.divf %120, %121 : vector<2x1xf32>
    %cst_64 = arith.constant 9.99999974E-6 : f32
    %123 = vector.broadcast %cst_64 : f32 to vector<2x1xf32>
    %124 = arith.addf %122, %123 : vector<2x1xf32>
    %125 = math.rsqrt %124 : vector<2x1xf32>
    %126 = vector.broadcast %125 : vector<2x1xf32> to vector<2x32xf32>
    %127 = arith.mulf %117, %126 : vector<2x32xf32>
    %c0_65 = arith.constant 0 : index
    %c0_66 = arith.constant 0 : index
    %128 = vector.load %arg6[%c0_65, %c0_66] : memref<1x32xf32, #tpu.memory_space<vmem>>, vector<1x32xf32>
    %129 = vector.broadcast %128 : vector<1x32xf32> to vector<2x32xf32>
    %130 = arith.mulf %127, %129 : vector<2x32xf32>
    %c0_67 = arith.constant 0 : index
    %c0_68 = arith.constant 0 : index
    %131 = vector.load %arg7[%c0_67, %c0_68] : memref<1x32xf32, #tpu.memory_space<vmem>>, vector<1x32xf32>
    %132 = vector.broadcast %131 : vector<1x32xf32> to vector<2x32xf32>
    %133 = arith.addf %130, %132 : vector<2x32xf32>
    %c0_69 = arith.constant 0 : index
    %c0_70 = arith.constant 0 : index
    %134 = vector.load %arg8[%c0_69, %c0_70] : memref<32x32xf32, #tpu.memory_space<vmem>>, vector<32x32xf32>
    %cst_71 = arith.constant dense<0.000000e+00> : vector<2x32xf32>
    %135 = tpu.matmul %133, %134, %cst_71 {dimension_numbers = #tpu.dot_dimension_numbers<[1], [0], [0], [1], [0, 0, 1, 1], [], []>} : vector<2x32xf32>, vector<32x32xf32>, vector<2x32xf32> -> vector<2x32xf32>
    %c0_72 = arith.constant 0 : index
    %c0_73 = arith.constant 0 : index
    %136 = vector.load %arg9[%c0_72, %c0_73] : memref<1x32xf32, #tpu.memory_space<vmem>>, vector<1x32xf32>
    %137 = vector.broadcast %136 : vector<1x32xf32> to vector<2x32xf32>
    %138 = arith.addf %135, %137 : vector<2x32xf32>
    %cst_74 = arith.constant 0.000000e+00 : f32
    %139 = vector.broadcast %cst_74 : f32 to vector<2x32xf32>
    %140 = arith.maximumf %138, %139 : vector<2x32xf32>
    %c0_75 = arith.constant 0 : index
    %c0_76 = arith.constant 0 : index
    %141 = vector.load %arg10[%c0_75, %c0_76] : memref<32x32xf32, #tpu.memory_space<vmem>>, vector<32x32xf32>
    %cst_77 = arith.constant dense<0.000000e+00> : vector<2x32xf32>
    %142 = tpu.matmul %140, %141, %cst_77 {dimension_numbers = #tpu.dot_dimension_numbers<[1], [0], [0], [1], [0, 0, 1, 1], [], []>} : vector<2x32xf32>, vector<32x32xf32>, vector<2x32xf32> -> vector<2x32xf32>
    %c0_78 = arith.constant 0 : index
    %c0_79 = arith.constant 0 : index
    %143 = vector.load %arg11[%c0_78, %c0_79] : memref<1x32xf32, #tpu.memory_space<vmem>>, vector<1x32xf32>
    %144 = vector.broadcast %143 : vector<1x32xf32> to vector<2x32xf32>
    %145 = arith.addf %142, %144 : vector<2x32xf32>
    %cst_80 = arith.constant 0.000000e+00 : f32
    %146 = vector.broadcast %cst_80 : f32 to vector<2x32xf32>
    %147 = arith.maximumf %145, %146 : vector<2x32xf32>
    %c0_81 = arith.constant 0 : index
    %c0_82 = arith.constant 0 : index
    %148 = vector.load %arg12[%c0_81, %c0_82] : memref<32x4xf32, #tpu.memory_space<vmem>>, vector<32x4xf32>
    %cst_83 = arith.constant dense<0.000000e+00> : vector<2x4xf32>
    %149 = tpu.matmul %147, %148, %cst_83 {dimension_numbers = #tpu.dot_dimension_numbers<[1], [0], [0], [1], [0, 0, 1, 1], [], []>} : vector<2x32xf32>, vector<32x4xf32>, vector<2x4xf32> -> vector<2x4xf32>
    %c0_84 = arith.constant 0 : index
    %c0_85 = arith.constant 0 : index
    %150 = vector.load %arg13[%c0_84, %c0_85] : memref<1x4xf32, #tpu.memory_space<vmem>>, vector<1x4xf32>
    %151 = vector.broadcast %150 : vector<1x4xf32> to vector<2x4xf32>
    %152 = arith.addf %149, %151 : vector<2x4xf32>
    %c0_86 = arith.constant 0 : index
    %c0_87 = arith.constant 0 : index
    %153 = vector.load %arg14[%c0_86, %c0_87] : memref<32x4xf32, #tpu.memory_space<vmem>>, vector<32x4xf32>
    %cst_88 = arith.constant dense<0.000000e+00> : vector<2x4xf32>
    %154 = tpu.matmul %147, %153, %cst_88 {dimension_numbers = #tpu.dot_dimension_numbers<[1], [0], [0], [1], [0, 0, 1, 1], [], []>} : vector<2x32xf32>, vector<32x4xf32>, vector<2x4xf32> -> vector<2x4xf32>
    %c0_89 = arith.constant 0 : index
    %c0_90 = arith.constant 0 : index
    %155 = vector.load %arg15[%c0_89, %c0_90] : memref<1x4xf32, #tpu.memory_space<vmem>>, vector<1x4xf32>
    %156 = vector.broadcast %155 : vector<1x4xf32> to vector<2x4xf32>
    %157 = arith.addf %154, %156 : vector<2x4xf32>
    %158 = math.tanh %157 : vector<2x4xf32>
    %cst_91 = arith.constant 1.000000e+00 : f32
    %159 = vector.broadcast %cst_91 : f32 to vector<2x4xf32>
    %160 = arith.addf %158, %159 : vector<2x4xf32>
    %cst_92 = arith.constant 6.000000e+00 : f32
    %161 = vector.broadcast %cst_92 : f32 to vector<2x4xf32>
    %162 = arith.mulf %161, %160 : vector<2x4xf32>
    %cst_93 = arith.constant -1.000000e+01 : f32
    %163 = vector.broadcast %cst_93 : f32 to vector<2x4xf32>
    %164 = arith.addf %163, %162 : vector<2x4xf32>
    %165 = math.exp %164 : vector<2x4xf32>
    %c0_94 = arith.constant 0 : index
    %c0_95 = arith.constant 0 : index
    %166 = vector.load %arg16[%c0_94, %c0_95] : memref<2x4xf32, #tpu.memory_space<vmem>>, vector<2x4xf32>
    %167 = arith.mulf %166, %165 : vector<2x4xf32>
    %168 = arith.addf %152, %167 : vector<2x4xf32>
    %cst_96 = arith.constant -5.000000e-01 : f32
    %169 = vector.broadcast %cst_96 : f32 to vector<2x4xf32>
    %170 = arith.mulf %169, %166 : vector<2x4xf32>
    %171 = arith.mulf %170, %166 : vector<2x4xf32>
    %172 = arith.subf %171, %164 : vector<2x4xf32>
    %cst_97 = arith.constant dense<0.000000e+00> : vector<2xf32>
    %173 = vector.multi_reduction <add>, %172, %cst_97 [1] : vector<2x4xf32> to vector<2xf32>
    %174 = vector.shape_cast %173 : vector<2xf32> to vector<2x1xf32>
    %cst_98 = arith.constant 3.67575407 : f32
    %175 = vector.broadcast %cst_98 : f32 to vector<2x1xf32>
    %176 = arith.subf %174, %175 : vector<2x1xf32>
    %177 = math.tanh %152 : vector<2x4xf32>
    %178 = math.tanh %168 : vector<2x4xf32>
    %179 = arith.mulf %178, %178 : vector<2x4xf32>
    %cst_99 = arith.constant 1.000000e+00 : f32
    %180 = vector.broadcast %cst_99 : f32 to vector<2x4xf32>
    %181 = arith.subf %180, %179 : vector<2x4xf32>
    %cst_100 = arith.constant 0.000000e+00 : f32
    %182 = vector.broadcast %cst_100 : f32 to vector<2x4xf32>
    %183 = arith.maximumf %181, %182 : vector<2x4xf32>
    %cst_101 = arith.constant 9.99999997E-7 : f32
    %184 = vector.broadcast %cst_101 : f32 to vector<2x4xf32>
    %185 = arith.addf %183, %184 : vector<2x4xf32>
    %186 = math.log %185 : vector<2x4xf32>
    %cst_102 = arith.constant dense<0.000000e+00> : vector<2xf32>
    %187 = vector.multi_reduction <add>, %186, %cst_102 [1] : vector<2x4xf32> to vector<2xf32>
    %188 = vector.shape_cast %187 : vector<2xf32> to vector<2x1xf32>
    %189 = arith.subf %176, %188 : vector<2x1xf32>
    %c0_103 = arith.constant 0 : index
    %c0_104 = arith.constant 0 : index
    %190 = vector.load %arg17[%c0_103, %c0_104] : memref<2x4xf32, #tpu.memory_space<vmem>>, vector<2x4xf32>
    tpu.vector_store %arg17[%c0_103, %c0_104], %177 {strides = array<i32>} : memref<2x4xf32, #tpu.memory_space<vmem>>, vector<2x4xf32>,
    %c0_105 = arith.constant 0 : index
    %c0_106 = arith.constant 0 : index
    %191 = vector.load %arg18[%c0_105, %c0_106] : memref<2x4xf32, #tpu.memory_space<vmem>>, vector<2x4xf32>
    tpu.vector_store %arg18[%c0_105, %c0_106], %178 {strides = array<i32>} : memref<2x4xf32, #tpu.memory_space<vmem>>, vector<2x4xf32>,
    %c0_107 = arith.constant 0 : index
    %c0_108 = arith.constant 0 : index
    %192 = vector.load %arg19[%c0_107, %c0_108] : memref<2x1xf32, #tpu.memory_space<vmem>>, vector<2x1xf32>
    tpu.vector_store %arg19[%c0_107, %c0_108], %189 {strides = array<i32>} : memref<2x1xf32, #tpu.memory_space<vmem>>, vector<2x1xf32>,
    %c0_109 = arith.constant 0 : index
    %c0_110 = arith.constant 0 : index
    %193 = vector.load %arg20[%c0_109, %c0_110] : memref<2x4xf32, #tpu.memory_space<vmem>>, vector<2x4xf32>
    tpu.vector_store %arg20[%c0_109, %c0_110], %164 {strides = array<i32>} : memref<2x4xf32, #tpu.memory_space<vmem>>, vector<2x4xf32>,
    return
  }
  func.func @transform_0(%arg0: i32) -> (i32, i32) {
    %c0_i32 = arith.constant 0 : i32
    %c0_i32_0 = arith.constant 0 : i32
    %c0_i32_1 = arith.constant 0 : i32
    return %c0_i32, %c0_i32_0 : i32, i32
  }
  func.func @transform_1(%arg0: i32) -> (i32, i32) {
    %c0_i32 = arith.constant 0 : i32
    %c0_i32_0 = arith.constant 0 : i32
    %c0_i32_1 = arith.constant 0 : i32
    return %c0_i32, %c0_i32_0 : i32, i32
  }
  func.func @transform_2(%arg0: i32) -> (i32, i32) {
    %c0_i32 = arith.constant 0 : i32
    %c0_i32_0 = arith.constant 0 : i32
    %c0_i32_1 = arith.constant 0 : i32
    return %c0_i32, %c0_i32_0 : i32, i32
  }
  func.func @transform_3(%arg0: i32) -> (i32, i32) {
    %c0_i32 = arith.constant 0 : i32
    %c0_i32_0 = arith.constant 0 : i32
    %c0_i32_1 = arith.constant 0 : i32
    return %c0_i32, %c0_i32_0 : i32, i32
  }
  func.func @transform_4(%arg0: i32) -> (i32, i32) {
    %c0_i32 = arith.constant 0 : i32
    %c0_i32_0 = arith.constant 0 : i32
    %c0_i32_1 = arith.constant 0 : i32
    return %c0_i32, %c0_i32_0 : i32, i32
  }
  func.func @transform_5(%arg0: i32) -> (i32, i32) {
    %c0_i32 = arith.constant 0 : i32
    %c0_i32_0 = arith.constant 0 : i32
    %c0_i32_1 = arith.constant 0 : i32
    return %c0_i32, %c0_i32_0 : i32, i32
  }
  func.func @transform_6(%arg0: i32) -> (i32, i32) {
    %c0_i32 = arith.constant 0 : i32
    %c0_i32_0 = arith.constant 0 : i32
    %c0_i32_1 = arith.constant 0 : i32
    return %c0_i32, %c0_i32_0 : i32, i32
  }
  func.func @transform_7(%arg0: i32) -> (i32, i32) {
    %c0_i32 = arith.constant 0 : i32
    %c0_i32_0 = arith.constant 0 : i32
    %c0_i32_1 = arith.constant 0 : i32
    return %c0_i32, %c0_i32_0 : i32, i32
  }
  func.func @transform_8(%arg0: i32) -> (i32, i32) {
    %c0_i32 = arith.constant 0 : i32
    %c0_i32_0 = arith.constant 0 : i32
    %c0_i32_1 = arith.constant 0 : i32
    return %c0_i32, %c0_i32_0 : i32, i32
  }
  func.func @transform_9(%arg0: i32) -> (i32, i32) {
    %c0_i32 = arith.constant 0 : i32
    %c0_i32_0 = arith.constant 0 : i32
    %c0_i32_1 = arith.constant 0 : i32
    return %c0_i32, %c0_i32_0 : i32, i32
  }
  func.func @transform_10(%arg0: i32) -> (i32, i32) {
    %c0_i32 = arith.constant 0 : i32
    %c0_i32_0 = arith.constant 0 : i32
    %c0_i32_1 = arith.constant 0 : i32
    return %c0_i32, %c0_i32_0 : i32, i32
  }
  func.func @transform_11(%arg0: i32) -> (i32, i32) {
    %c0_i32 = arith.constant 0 : i32
    %c0_i32_0 = arith.constant 0 : i32
    %c0_i32_1 = arith.constant 0 : i32
    return %c0_i32, %c0_i32_0 : i32, i32
  }
  func.func @transform_12(%arg0: i32) -> (i32, i32) {
    %c0_i32 = arith.constant 0 : i32
    %c0_i32_0 = arith.constant 0 : i32
    %c0_i32_1 = arith.constant 0 : i32
    return %c0_i32, %c0_i32_0 : i32, i32
  }
  func.func @transform_13(%arg0: i32) -> (i32, i32) {
    %c0_i32 = arith.constant 0 : i32
    %c0_i32_0 = arith.constant 0 : i32
    %c0_i32_1 = arith.constant 0 : i32
    return %c0_i32, %c0_i32_0 : i32, i32
  }
  func.func @transform_14(%arg0: i32) -> (i32, i32) {
    %c0_i32 = arith.constant 0 : i32
    %c0_i32_0 = arith.constant 0 : i32
    %c0_i32_1 = arith.constant 0 : i32
    return %c0_i32, %c0_i32_0 : i32, i32
  }
  func.func @transform_15(%arg0: i32) -> (i32, i32) {
    %c0_i32 = arith.constant 0 : i32
    %c0_i32_0 = arith.constant 0 : i32
    %c0_i32_1 = arith.constant 0 : i32
    return %c0_i32, %c0_i32_0 : i32, i32
  }
  func.func @transform_16(%arg0: i32) -> (i32, i32) {
    %c0_i32 = arith.constant 0 : i32
    %c0_i32_0 = arith.constant 0 : i32
    %c0_i32_1 = arith.constant 0 : i32
    return %c0_i32, %c0_i32_0 : i32, i32
  }
  func.func @transform_17(%arg0: i32) -> (i32, i32) {
    %c0_i32 = arith.constant 0 : i32
    %c0_i32_0 = arith.constant 0 : i32
    %c0_i32_1 = arith.constant 0 : i32
    return %c0_i32, %c0_i32_0 : i32, i32
  }
  func.func @transform_18(%arg0: i32) -> (i32, i32) {
    %c0_i32 = arith.constant 0 : i32
    %c0_i32_0 = arith.constant 0 : i32
    %c0_i32_1 = arith.constant 0 : i32
    return %c0_i32, %c0_i32_0 : i32, i32
  }
  func.func @transform_19(%arg0: i32) -> (i32, i32) {
    %c0_i32 = arith.constant 0 : i32
    %c0_i32_0 = arith.constant 0 : i32
    %c0_i32_1 = arith.constant 0 : i32
    return %c0_i32, %c0_i32_0 : i32, i32
  }
}

</mosaic_0001>

<bundles_post_ra>
// kernel: actor_forward.2
= control target key start
LH: loop header
LB: loop body
LE: loop exit
PB: predicated region body
PF: predicated region fallthrough
CT: control target
= control target key end

     0   :  { %v143_v0 = vmov 0.0|0.0   ;;  %vm144_vm0 = vmmov 0   ;;  %v145_v4 = vmov 0.0   ;;  %v146_v7 = vmov 0   ;;  %s191_s1 = inlined_call_operand.vmem [shape: f32[36,98], index: 1, kind: input, shape index: {}]   ;;  %s192_s2 = inlined_call_operand.vmem [shape: f32[8,1], index: 2, kind: input, shape index: {}]   ;;  %s193_s0 = inlined_call_operand.vmem [shape: f32[8,36], index: 0, kind: input, shape index: {}]   ;;  %s194_s3 = inlined_call_operand.vmem [shape: f32[8,98], index: 3, kind: output, shape index: {}]  }
   0x1   :  { %132 = vmatprep.subr.bf16.mxu0 %v143_v0  ;;  %v15_v1 = vld [vmem:[%s191_s1] sm:$0xff]  ;;  %v16_v2 = vld [vmem:[%s191_s1 + $0x8] sm:$0xff]  ;;  %v17_v3 = vld [vmem:[%s191_s1 + $0x10] sm:$0xff]  ;;  %129 = vmatprep.mubr.msk.f32.mxu0 %vm144_vm0, %v145_v4  ;;  %vm30_vm1 = vcmask 1043456   ;;  %vm26_vm2 = vcmask 293888   ;;  %vm105_vm3 = vcmask 801792  }
   0x2   :  { %v133_v5 = vpack.c.bf16 %v16_v2, %v15_v1  ;;  %v18_v6 = vld [vmem:[%s191_s1 + $0x18] sm:$0xff]  ;;  %142 = vset.pattern.permute.xlu0 %v146_v7  ;;  %v20_v8 = vld [vmem:[%s192_s2] sm:$0xff] }
   0x3   :  { %v136_v9 = vpack.c.bf16 %v18_v6, %v17_v3  ;;  %23 = vperm.xlu0 %142, %v20_v8   ;;  %v19_v10 = vld [vmem:[%s191_s1 + $0x20] sm:$0xf] }
   0x4   :  { %134 = vmatpush3.bf16.msra.mxu0 %v133_v5  ;;  %v14_v11 = vld [vmem:[%s193_s0] sm:$0xff] }
   0x5   :  { %135 = vmatprep.subr.bf16.mxu0 %v143_v0 }
   0x8   :  { %137 = vmatpush3.bf16.msra.mxu0 %v136_v9 }
   0x9   :  { %127 = vmatprep.subr.mxu0 %v145_v4 }
   0xc   :  { %128 = vmatpush3.msk.msra.mxu0 %vm30_vm1, %v19_v10 }
   0xd   :  { %130 = vmatmul.mubr.msk.f32.vlgmr.msra.gmra.mrb[0].mxu0 %vm26_vm2, %v14_v11 }
  0x82   :  { %v24_v12 = vpop.permute.xlu0 %23 }
  0xe0   :  { %v100_v13 = vpop.f32.mrb[0].mxu0 }
  0xe1   :  { %v101_v14 = vadd.f32 %v100_v13, %v24_v12  ;;  %v131_v15 = vpop.f32.mrb[1].mxu0 }
  0xe3   :  { %v104_v16 = vmax.f32 %v101_v14, 0.0 }
  0xe5   :  { %106 = vst.msk [vmem:[%s194_s3] sm:$0xff] %vm105_vm3, %v104_v16 }

// kernel: actor_forward.3
= control target key start
LH: loop header
LB: loop body
LE: loop exit
PB: predicated region body
PF: predicated region fallthrough
CT: control target
= control target key end

     0   :  { %s3532_s0 = inlined_call_operand.vmem [shape: f32[50,72], index: 0, kind: input, shape index: {}]   ;;  %s3533_s1 = inlined_call_operand.vmem [shape: f32[72,8], index: 1, kind: input, shape index: {}]   ;;  %s3534_s2 = inlined_call_operand.vmem [shape: f32[1,8], index: 2, kind: input, shape index: {}]   ;;  %s3535_s3 = inlined_call_operand.vmem [shape: f32[200,32], index: 3, kind: input, shape index: {}]   ;;  %s3536_s4 = inlined_call_operand.vmem [shape: f32[1,32], index: 4, kind: input, shape index: {}]   ;;  %s3537_s5 = inlined_call_operand.vmem [shape: f32[1,32], index: 5, kind: input, shape index: {}]   ;;  %s3538_s6 = inlined_call_operand.vmem [shape: f32[1,32], index: 6, kind: input, shape index: {}]   ;;  %s3539_s7 = inlined_call_operand.vmem [shape: f32[32,32], index: 7, kind: input, shape index: {}]   ;;  %s3540_s8 = inlined_call_operand.vmem [shape: f32[1,32], index: 8, kind: input, shape index: {}]   ;;  %s3541_s9 = inlined_call_operand.vmem [shape: f32[32,32], index: 9, kind: input, shape index: {}]   ;;  %s3542_s10 = inlined_call_operand.vmem [shape: f32[1,32], index: 10, kind: input, shape index: {}]   ;;  %s3543_s11 = inlined_call_operand.vmem [shape: f32[32,4], index: 11, kind: input, shape index: {}]   ;;  %s3544_s12 = inlined_call_operand.vmem [shape: f32[1,4], index: 12, kind: input, shape index: {}]   ;;  %s3545_s13 = inlined_call_operand.vmem [shape: f32[32,4], index: 13, kind: input, shape index: {}]   ;;  %s3546_s14 = inlined_call_operand.vmem [shape: f32[1,4], index: 14, kind: input, shape index: {}]   ;;  %s3547_s15 = inlined_call_operand.vmem [shape: f32[2,4], index: 15, kind: input, shape index: {}]   ;;  %s3548_s16 = inlined_call_operand.hbm [shape: f32[2,4], index: 16, kind: output, shape index: {0}]   ;;  %s3549_s17 = inlined_call_operand.hbm [shape: f32[2,4], index: 17, kind: output, shape index: {1}]   ;;  %s3550_s18 = inlined_call_operand.vmem [shape: f32[2,1], index: 18, kind: output, shape index: {2}]   ;;  %s3551_s19 = inlined_call_operand.hbm [shape: f32[2,4], index: 19, kind: output, shape index: {3}]  }
   0x1   :  { %3555 = sst [smem:[#allocation9_spill]] %s3532_s0 }
   0x2   :  { %3556 = sst [smem:[#allocation10_spill]] %s3533_s1 }
   0x3   :  { %3557 = sst [smem:[#allocation11_spill]] %s3534_s2 }
   0x4   :  { %3558 = sst [smem:[#allocation12_spill]] %s3535_s3 }
   0x5   :  { %25 = vsyncpa [#allocation3], 0  ;;  %s3559_s20 = sld [smem:[#allocation10_spill]]  ;;  %v3002_v3 = vmov 0.0|0.0   ;;  %vm3003_vm0 = vmmov 0   ;;  %v3004_v6 = vmov 0.0  }
   0x6   :  { %2878 = vmatprep.subr.bf16.mxu0 %v3002_v3  ;;  %2688 = vmatprep.mubr.msk.f32.mxu0 %vm3003_vm0, %v3004_v6 }
   0x7   :  { %2709 = vmatprep.subr.mxu1 %v3004_v6  ;;  %2711 = vmatprep.mubr.msk.f32.mxu1 %vm3003_vm0, %v3004_v6 }
   0xb   :  { %v66_v0 = vld [vmem:[%s3559_s20] sm:$0xff]  ;;  %v67_v1 = vld [vmem:[%s3559_s20 + $0x8] sm:$0xff]  ;;  %v68_v2 = vld [vmem:[%s3559_s20 + $0x10] sm:$0xff] }
   0xc   :  { %v2879_v4 = vpack.c.bf16 %v67_v1, %v66_v0  ;;  %v69_v5 = vld [vmem:[%s3559_s20 + $0x18] sm:$0xff]  ;;  %v70_v8 = vld [vmem:[%s3559_s20 + $0x20] sm:$0xff]  ;;  %v71_v9 = vld [vmem:[%s3559_s20 + $0x28] sm:$0xff] }
   0xd   :  { %v2882_v7 = vpack.c.bf16 %v69_v5, %v68_v2 }
   0xe   :  { %2880 = vmatpush3.bf16.msra.mxu0 %v2879_v4 }
   0xf   :  { %2881 = vmatprep.subr.bf16.mxu0 %v3002_v3 }
  0x10   :  { %26 = vsyncpa [#allocation5], 0  ;;  %v2885_v10 = vpack.c.bf16 %v71_v9, %v70_v8  ;;  %v72_v11 = vld [vmem:[%s3559_s20 + $0x30] sm:$0xff]  ;;  %v73_v12 = vld [vmem:[%s3559_s20 + $0x38] sm:$0xff]  ;;  %s3560_s23 = sld [smem:[#allocation9_spill]]  ;;  %vm82_vm1 = vcmask 588800  }
  0x11   :  { %v2888_v13 = vpack.c.bf16 %v73_v12, %v72_v11  ;;  %v74_v14 = vld [vmem:[%s3559_s20 + $0x40] sm:$0xff]  ;;  %s3561_s24 = sld [smem:[#allocation12_spill]]  ;;  %s3562_s26 = sld [smem:[#allocation11_spill]]  ;;  %vm215_vm2 = vcmask 64512   ;;  %vm2093_vm3 = vcmask 254976   ;;  %vm2135_vm4 = vcmask 261120  }
  0x12   :  { %2883 = vmatpush3.bf16.msra.mxu0 %v2882_v7  ;;  %vm2472_vm5 = vcmask 25600  }
  0x13   :  { %2884 = vmatprep.subr.bf16.mxu0 %v3002_v3 }
  0x16   :  { %2886 = vmatpush3.bf16.msra.mxu0 %v2885_v10  ;;  %v59_v15 = vld [vmem:[%s3560_s23] sm:$0xff]  ;;  %v60_v16 = vld [vmem:[%s3560_s23 + $0x8] sm:$0xff]  ;;  %v61_v17 = vld [vmem:[%s3560_s23 + $0x10] sm:$0xff] }
  0x17   :  { %2887 = vmatprep.subr.bf16.mxu0 %v3002_v3  ;;  %v62_v18 = vld [vmem:[%s3560_s23 + $0x18] sm:$0xff]  ;;  %v63_v19 = vld [vmem:[%s3560_s23 + $0x20] sm:$0xff]  ;;  %v64_v20 = vld [vmem:[%s3560_s23 + $0x28] sm:$0xff] }
  0x18   :  { %v65_v21 = vld [vmem:[%s3560_s23 + $0x30] sm:$0x3]  ;;  %v212_v22 = vld [vmem:[%s3561_s24 + $0x8] sm:$0xff]  ;;  %v1035_v23 = vld [vmem:[%s3561_s24 + $0x58] sm:$0xff] }
  0x19   :  { %2710 = vmatpush3.msra.mxu1 %v212_v22  ;;  %v3199_v24 = vld [vmem:[%s3562_s26] ss:$0 sm:$0xff]  ;;  %v360_v34 = vld [vmem:[%s3561_s24 + $0x10] sm:$0xff]  ;;  %v435_v40 = vld [vmem:[%s3561_s24 + $0x18] sm:$0xff] }
  0x1a   :  { %2889 = vmatpush3.bf16.msra.mxu0 %v2888_v13  ;;  %2714 = vmatprep.subr.mxu1 %v3004_v6  ;;  %v211_v31 = vld [vmem:[%s3561_s24] sm:$0xff]  ;;  %v1185_v44 = vld [vmem:[%s3561_s24 + $0x68] sm:$0xff]  ;;  %v1335_v53 = vld [vmem:[%s3561_s24 + $0x78] sm:$0xff] }
  0x1b   :  { %2686 = vmatprep.subr.mxu0 %v3004_v6  ;;  %v510_v49 = vld [vmem:[%s3561_s24 + $0x20] sm:$0xff]  ;;  %v585_v58 = vld [vmem:[%s3561_s24 + $0x28] sm:$0xff]  ;;  %v660_v1 = vld [vmem:[%s3561_s24 + $0x30] sm:$0xff] }
  0x1c   :  { %v1485_v60 = vld [vmem:[%s3561_s24 + $0x88] sm:$0xff]  ;;  %v1635_v5 = vld [vmem:[%s3561_s24 + $0x98] sm:$0xff]  ;;  %v1260_v22 = vld [vmem:[%s3561_s24 + $0x70] sm:$0xff] }
  0x1d   :  { %v735_v10 = vld [vmem:[%s3561_s24 + $0x38] sm:$0xff]  ;;  %v1785_v11 = vld [vmem:[%s3561_s24 + $0xa8] sm:$0xff] }
  0x1e   :  { %2687 = vmatpush3.msra.mxu0 %v74_v14  ;;  %v810_v14 = vld [vmem:[%s3561_s24 + $0x40] sm:$0xff] }
  0x1f   :  { %2689 = vmatmul.mubr.msk.f32.vlgmr.msra.gmra.mrb[0].mxu0 %vm82_vm1, %v59_v15  ;;  %2764 = vmatprep.subr.mxu0 %v3004_v6  ;;  %v1935_v15 = vld [vmem:[%s3561_s24 + $0xb8] sm:$0xff] }
  0x20   :  { %2691 = vmatprep.mubr.msk.f32.mxu0 %vm3003_vm0, %v3004_v6  ;;  %2765 = vmatpush3.msra.mxu0 %v1035_v23 }
  0x21   :  { %2774 = vmatprep.subr.mxu0 %v3004_v6 }
  0x23   :  { %2692 = vmatmul.mubr.msk.f32.gmra.mrb[2].mxu0 %vm82_vm1, %v60_v16 }
  0x24   :  { %2694 = vmatprep.mubr.msk.f32.mxu0 %vm3003_vm0, %v3004_v6 }
  0x27   :  { %2695 = vmatmul.mubr.msk.f32.gmra.mrb[4].mxu0 %vm82_vm1, %v61_v17  ;;  %v885_v17 = vld [vmem:[%s3561_s24 + $0x48] sm:$0xff] }
  0x28   :  { %2697 = vmatprep.mubr.msk.f32.mxu0 %vm3003_vm0, %v3004_v6 }
  0x2b   :  { %2698 = vmatmul.mubr.msk.f32.gmra.mrb[6].mxu0 %vm82_vm1, %v62_v18 }
  0x2c   :  { %2700 = vmatprep.mubr.msk.f32.mxu0 %vm3003_vm0, %v3004_v6 }
  0x2f   :  { %2701 = vmatmul.mubr.msk.f32.gmra.mrb[8].mxu0 %vm82_vm1, %v63_v19  ;;  %v960_v19 = vld [vmem:[%s3561_s24 + $0x50] sm:$0xff] }
  0x30   :  { %2703 = vmatprep.mubr.msk.f32.mxu0 %vm3003_vm0, %v3004_v6 }
  0x33   :  { %2704 = vmatmul.mubr.msk.f32.gmra.mrb[10].mxu0 %vm82_vm1, %v64_v20 }
  0x34   :  { %2706 = vmatprep.mubr.msk.f32.mxu0 %vm3003_vm0, %v3004_v6 }
  0x37   :  { %2707 = vmatmul.mubr.msk.f32.gmra.mrb[12].mxu0 %vm82_vm1, %v65_v21  ;;  %v1110_v21 = vld [vmem:[%s3561_s24 + $0x60] sm:$0xff] }
  0x38   :  { %2766 = vmatprep.mubr.msk.f32.mxu0 %vm3003_vm0, %v3004_v6 }
  0xf2   :  { %v170_v25 = vpop.f32.mrb[0].mxu0 }
  0xf3   :  { %v171_v26 = vadd.f32 %v3199_v24, %v170_v25  ;;  %v2690_v27 = vpop.f32.mrb[1].mxu0  ;;  %v1560_v25 = vld [vmem:[%s3561_s24 + $0x90] sm:$0xff] }
  0xf4   :  { %v1710_v27 = vld [vmem:[%s3561_s24 + $0xa0] sm:$0xff] }
  0xf5   :  { %v204_v28 = vmax.f32 %v171_v26, 0.0 }
  0xf6   :  { %v175_v29 = vpop.f32.mrb[2].mxu0 }
  0xf7   :  { %v214_v30 = vrot.slane %v204_v28, 2  ;;  %v2693_v32 = vpop.f32.mrb[3].mxu0  ;;  %v361_v39 = vrot.slane %v204_v28, 4  ;;  %v176_v45 = vadd.f32 %v3199_v24, %v175_v29  ;;  %v436_v48 = vrot.slane %v204_v28, 6 }
  0xf9   :  { %2712 = vmatmul.mubr.msk.f32.vlgmr.msra.gmra.mrb[0].mxu1 %vm215_vm2, %v214_v30  ;;  %v205_v54 = vmax.f32 %v176_v45, 0.0  ;;  %v2010_v30 = vld [vmem:[%s3561_s24 + $0xc0] sm:$0xff] }
  0xfa   :  { %2715 = vmatpush3.msra.mxu1 %v211_v31  ;;  %2716 = vmatprep.mubr.msk.f32.mxu1 %vm3003_vm0, %v3004_v6  ;;  %v180_v33 = vpop.f32.mrb[4].mxu0 }
  0xfb   :  { %2719 = vmatprep.subr.mxu1 %v3004_v6  ;;  %v181_v35 = vadd.f32 %v3199_v24, %v180_v33  ;;  %v2696_v36 = vpop.f32.mrb[5].mxu0  ;;  %v586_v0 = vrot.slane %v205_v54, 2  ;;  %v661_v9 = vrot.slane %v205_v54, 4  ;;  %v736_v13 = vrot.slane %v205_v54, 6 }
  0xfd   :  { %2717 = vmatmul.mubr.msk.f32.vlgmr.msra.gmra.mrb[2].mxu1 %vm215_vm2, %v204_v28  ;;  %v3214_v37 = vmax.f32 %v181_v35, 0.0  ;;  %v1860_v28 = vld [vmem:[%s3561_s24 + $0xb0] sm:$0xff] }
  0xfe   :  { %2720 = vmatpush3.msra.mxu1 %v360_v34  ;;  %2721 = vmatprep.mubr.msk.f32.mxu1 %vm3003_vm0, %v3004_v6  ;;  %v185_v38 = vpop.f32.mrb[6].mxu0 }
  0xff   :  { %2724 = vmatprep.subr.mxu1 %v3004_v6  ;;  %v1036_v41 = vrot.slane %v3214_v37, 6  ;;  %v186_v42 = vadd.f32 %v3199_v24, %v185_v38  ;;  %v2699_v43 = vpop.f32.mrb[7].mxu0  ;;  %v886_v18 = vrot.slane %v3214_v37, 2  ;;  %v961_v20 = vrot.slane %v3214_v37, 4 }
 0x101   :  { %2722 = vmatmul.mubr.msk.f32.vlgmr.msra.gmra.mrb[4].mxu1 %vm215_vm2, %v361_v39  ;;  %2767 = vmatmul.mubr.msk.f32.vlgmr.msra.gmra.mrb[14].mxu0 %vm215_vm2, %v1036_v41  ;;  %v3230_v46 = vmax.f32 %v186_v42, 0.0 }
 0x102   :  { %2725 = vmatpush3.msra.mxu1 %v435_v40  ;;  %2726 = vmatprep.mubr.msk.f32.mxu1 %vm3003_vm0, %v3004_v6  ;;  %v190_v47 = vpop.f32.mrb[8].mxu0 }
 0x103   :  { %2729 = vmatprep.subr.mxu1 %v3004_v6  ;;  %v1186_v50 = vrot.slane %v3230_v46, 2  ;;  %2775 = vmatpush3.msra.mxu0 %v1185_v44  ;;  %v191_v51 = vadd.f32 %v3199_v24, %v190_v47  ;;  %v2702_v52 = vpop.f32.mrb[9].mxu0  ;;  %v1336_v55 = vrot.slane %v3230_v46, 6  ;;  %v1261_v23 = vrot.slane %v3230_v46, 4 }
 0x104   :  { %2776 = vmatprep.mubr.msk.f32.mxu0 %vm3003_vm0, %v3004_v6  ;;  %2784 = vmatprep.subr.mxu0 %v3004_v6 }
 0x105   :  { %2727 = vmatmul.mubr.msk.f32.vlgmr.msra.gmra.mrb[6].mxu1 %vm215_vm2, %v436_v48  ;;  %2777 = vmatmul.mubr.msk.f32.vlgmr.msra.gmra.mrb[16].mxu0 %vm215_vm2, %v1186_v50  ;;  %v3249_v56 = vmax.f32 %v191_v51, 0.0 }
 0x106   :  { %2730 = vmatpush3.msra.mxu1 %v510_v49  ;;  %2731 = vmatprep.mubr.msk.f32.mxu1 %vm3003_vm0, %v3004_v6  ;;  %v195_v57 = vpop.f32.mrb[10].mxu0 }
 0x107   :  { %2734 = vmatprep.subr.mxu1 %v3004_v6  ;;  %2785 = vmatpush3.msra.mxu0 %v1335_v53  ;;  %v2705_v59 = vpop.f32.mrb[11].mxu0  ;;  %v1486_v61 = vrot.slane %v3249_v56, 2  ;;  %v196_v62 = vadd.f32 %v3199_v24, %v195_v57  ;;  %v1636_v7 = vrot.slane %v3249_v56, 6  ;;  %v1561_v26 = vrot.slane %v3249_v56, 4 }
 0x108   :  { %2786 = vmatprep.mubr.msk.f32.mxu0 %vm3003_vm0, %v3004_v6  ;;  %2794 = vmatprep.subr.mxu0 %v3004_v6 }
 0x109   :  { %2732 = vmatmul.mubr.msk.f32.vlgmr.msra.gmra.mrb[8].mxu1 %vm215_vm2, %v205_v54  ;;  %2787 = vmatmul.mubr.msk.f32.vlgmr.msra.gmra.mrb[18].mxu0 %vm215_vm2, %v1336_v55  ;;  %v3285_v8 = vmax.f32 %v196_v62, 0.0 }
 0x10a   :  { %2735 = vmatpush3.msra.mxu1 %v585_v58  ;;  %2736 = vmatprep.mubr.msk.f32.mxu1 %vm3003_vm0, %v3004_v6  ;;  %v200_v63 = vpop.f32.mrb[12].mxu0 }
 0x10b   :  { %2739 = vmatprep.subr.mxu1 %v3004_v6  ;;  %2795 = vmatpush3.msra.mxu0 %v1485_v60  ;;  %v3274_v2 = vadd.f32 %v3199_v24, %v200_v63  ;;  %v2708_v4 = vpop.f32.mrb[13].mxu0  ;;  %v1786_v12 = vrot.slane %v3285_v8, 2  ;;  %v1936_v16 = vrot.slane %v3285_v8, 6  ;;  %v1410_v24 = vld [vmem:[%s3561_s24 + $0x80] sm:$0xff]  ;;  %v1861_v29 = vrot.slane %v3285_v8, 4 }
 0x10c   :  { %2796 = vmatprep.mubr.msk.f32.mxu0 %vm3003_vm0, %v3004_v6  ;;  %2804 = vmatprep.subr.mxu0 %v3004_v6 }
 0x10d   :  { %2737 = vmatmul.mubr.msk.f32.vlgmr.msra.gmra.mrb[10].mxu1 %vm215_vm2, %v586_v0  ;;  %2797 = vmatmul.mubr.msk.f32.vlgmr.msra.gmra.mrb[20].mxu0 %vm215_vm2, %v1486_v61  ;;  %v210_v31 = vmax.f32 %v3274_v2, 0.0 }
 0x10e   :  { %2740 = vmatpush3.msra.mxu1 %v660_v1  ;;  %2741 = vmatprep.mubr.msk.f32.mxu1 %vm3003_vm0, %v3004_v6 }
 0x10f   :  { %2744 = vmatprep.subr.mxu1 %v3004_v6  ;;  %2805 = vmatpush3.msra.mxu0 %v1635_v5 }
 0x110   :  { %2806 = vmatprep.mubr.msk.f32.mxu0 %vm3003_vm0, %v3004_v6  ;;  %2814 = vmatprep.subr.mxu0 %v3004_v6 }
 0x111   :  { %2742 = vmatmul.mubr.msk.f32.vlgmr.msra.gmra.mrb[12].mxu1 %vm215_vm2, %v661_v9  ;;  %2807 = vmatmul.mubr.msk.f32.vlgmr.msra.gmra.mrb[22].mxu0 %vm215_vm2, %v1636_v7 }
 0x112   :  { %2745 = vmatpush3.msra.mxu1 %v735_v10  ;;  %2746 = vmatprep.mubr.msk.f32.mxu1 %vm3003_vm0, %v3004_v6 }
 0x113   :  { %2749 = vmatprep.subr.mxu1 %v3004_v6  ;;  %2815 = vmatpush3.msra.mxu0 %v1785_v11 }
 0x114   :  { %2816 = vmatprep.mubr.msk.f32.mxu0 %vm3003_vm0, %v3004_v6  ;;  %2824 = vmatprep.subr.mxu0 %v3004_v6 }
 0x115   :  { %2747 = vmatmul.mubr.msk.f32.vlgmr.msra.gmra.mrb[14].mxu1 %vm215_vm2, %v736_v13  ;;  %2817 = vmatmul.mubr.msk.f32.vlgmr.msra.gmra.mrb[24].mxu0 %vm215_vm2, %v1786_v12 }
 0x116   :  { %2750 = vmatpush3.msra.mxu1 %v810_v14  ;;  %2751 = vmatprep.mubr.msk.f32.mxu1 %vm3003_vm0, %v3004_v6 }
 0x117   :  { %2754 = vmatprep.subr.mxu1 %v3004_v6  ;;  %2825 = vmatpush3.msra.mxu0 %v1935_v15 }
 0x118   :  { %2826 = vmatprep.mubr.msk.f32.mxu0 %vm3003_vm0, %v3004_v6  ;;  %2890 = vmatprep.subr.bf16.mxu0 %v3002_v3 }
 0x119   :  { %2752 = vmatmul.mubr.msk.f32.vlgmr.msra.gmra.mrb[16].mxu1 %vm215_vm2, %v3214_v37  ;;  %2827 = vmatmul.mubr.msk.f32.vlgmr.msra.gmra.mrb[26].mxu0 %vm215_vm2, %v1936_v16 }
 0x11a   :  { %2755 = vmatpush3.msra.mxu1 %v885_v17  ;;  %2756 = vmatprep.mubr.msk.f32.mxu1 %vm3003_vm0, %v3004_v6 }
 0x11b   :  { %2759 = vmatprep.subr.mxu1 %v3004_v6  ;;  %2842 = vmatprep.mubr.msk.f32.mxu0 %vm3003_vm0, %v3004_v6 }
 0x11d   :  { %2757 = vmatmul.mubr.msk.f32.vlgmr.msra.gmra.mrb[18].mxu1 %vm215_vm2, %v886_v18 }
 0x11e   :  { %2760 = vmatpush3.msra.mxu1 %v960_v19  ;;  %2761 = vmatprep.mubr.msk.f32.mxu1 %vm3003_vm0, %v3004_v6 }
 0x11f   :  { %2769 = vmatprep.subr.mxu1 %v3004_v6 }
 0x121   :  { %2762 = vmatmul.mubr.msk.f32.vlgmr.msra.gmra.mrb[20].mxu1 %vm215_vm2, %v961_v20 }
 0x122   :  { %2770 = vmatpush3.msra.mxu1 %v1110_v21  ;;  %2771 = vmatprep.mubr.msk.f32.mxu1 %vm3003_vm0, %v3004_v6 }
 0x123   :  { %2779 = vmatprep.subr.mxu1 %v3004_v6 }
 0x125   :  { %2772 = vmatmul.mubr.msk.f32.vlgmr.msra.gmra.mrb[22].mxu1 %vm215_vm2, %v3230_v46 }
 0x126   :  { %2780 = vmatpush3.msra.mxu1 %v1260_v22  ;;  %2781 = vmatprep.mubr.msk.f32.mxu1 %vm3003_vm0, %v3004_v6 }
 0x127   :  { %2789 = vmatprep.subr.mxu1 %v3004_v6 }
 0x129   :  { %2782 = vmatmul.mubr.msk.f32.vlgmr.msra.gmra.mrb[24].mxu1 %vm215_vm2, %v1261_v23 }
 0x12a   :  { %2790 = vmatpush3.msra.mxu1 %v1410_v24  ;;  %2791 = vmatprep.mubr.msk.f32.mxu1 %vm3003_vm0, %v3004_v6 }
 0x12b   :  { %2799 = vmatprep.subr.mxu1 %v3004_v6 }
 0x12d   :  { %2792 = vmatmul.mubr.msk.f32.vlgmr.msra.gmra.mrb[26].mxu1 %vm215_vm2, %v3249_v56 }
 0x12e   :  { %2800 = vmatpush3.msra.mxu1 %v1560_v25  ;;  %2801 = vmatprep.mubr.msk.f32.mxu1 %vm3003_vm0, %v3004_v6 }
 0x12f   :  { %2809 = vmatprep.subr.mxu1 %v3004_v6 }
 0x131   :  { %2802 = vmatmul.mubr.msk.f32.vlgmr.msra.gmra.mrb[28].mxu1 %vm215_vm2, %v1561_v26 }
 0x132   :  { %2810 = vmatpush3.msra.mxu1 %v1710_v27  ;;  %2811 = vmatprep.mubr.msk.f32.mxu1 %vm3003_vm0, %v3004_v6 }
 0x133   :  { %2819 = vmatprep.subr.mxu1 %v3004_v6 }
 0x135   :  { %2812 = vmatmul.mubr.msk.f32.vlgmr.msra.gmra.mrb[30].mxu1 %vm215_vm2, %v3285_v8 }
 0x136   :  { %2820 = vmatpush3.msra.mxu1 %v1860_v28  ;;  %2821 = vmatprep.mubr.msk.f32.mxu1 %vm3003_vm0, %v3004_v6 }
 0x137   :  { %2829 = vmatprep.subr.mxu1 %v3004_v6 }
 0x139   :  { %2822 = vmatmul.mubr.msk.f32.vlgmr.msra.gmra.mrb[32].mxu1 %vm215_vm2, %v1861_v29 }
 0x13a   :  { %2830 = vmatpush3.msra.mxu1 %v2010_v30  ;;  %2831 = vmatprep.mubr.msk.f32.mxu1 %vm3003_vm0, %v3004_v6 }
 0x13b   :  { %2896 = vmatprep.subr.bf16.mxu1 %v3002_v3 }
 0x13d   :  { %2832 = vmatmul.mubr.msk.f32.vlgmr.msra.gmra.mrb[34].mxu1 %vm215_vm2, %v210_v31 }
 0x13e   :  { %2853 = vmatprep.mubr.msk.f32.mxu1 %vm3003_vm0, %v3004_v6 }
 0x1cc   :  { %v284_v32 = vpop.f32.mrb[0].mxu1 }
 0x1cd   :  { %v2713_v33 = vpop.f32.mrb[1].mxu1 }
 0x1d0   :  { %v356_v34 = vpop.f32.mrb[2].mxu1 }
 0x1d1   :  { %v357_v35 = vadd.f32 %v356_v34, %v284_v32  ;;  %v2718_v36 = vpop.f32.mrb[3].mxu1 }
 0x1d4   :  { %v430_v37 = vpop.f32.mrb[4].mxu1  ;;  %v1105_v38 = vpop.f32.mrb[14].mxu0 }
 0x1d5   :  { %v434_v39 = vadd.f32 %v430_v37, %v357_v35  ;;  %v2723_v40 = vpop.f32.mrb[5].mxu1  ;;  %v2768_v41 = vpop.f32.mrb[15].mxu0 }
 0x1d8   :  { %v505_v42 = vpop.f32.mrb[6].mxu1  ;;  %v1255_v43 = vpop.f32.mrb[16].mxu0 }
 0x1d9   :  { %v509_v44 = vadd.f32 %v505_v42, %v434_v39  ;;  %v2728_v45 = vpop.f32.mrb[7].mxu1  ;;  %v2778_v46 = vpop.f32.mrb[17].mxu0  ;;  %v2572_v42 = vld [vmem:[%s3536_s4] ss:$0 sm:$0xff] }
 0x1dc   :  { %v580_v47 = vpop.f32.mrb[8].mxu1  ;;  %v1405_v48 = vpop.f32.mrb[18].mxu0 }
 0x1dd   :  { %v584_v49 = vadd.f32 %v580_v47, %v509_v44  ;;  %v2733_v50 = vpop.f32.mrb[9].mxu1  ;;  %v2788_v51 = vpop.f32.mrb[19].mxu0 }
 0x1e0   :  { %v655_v52 = vpop.f32.mrb[10].mxu1  ;;  %v1555_v53 = vpop.f32.mrb[20].mxu0 }
 0x1e1   :  { %v659_v54 = vadd.f32 %v655_v52, %v584_v49  ;;  %v2738_v55 = vpop.f32.mrb[11].mxu1  ;;  %v2798_v56 = vpop.f32.mrb[21].mxu0  ;;  %v2124_v52 = vld [vmem:[%s3539_s7] sm:$0xff] }
 0x1e2   :  { %v2126_v55 = vld [vmem:[%s3539_s7 + $0x10] sm:$0xff]  ;;  %v2127_v56 = vld [vmem:[%s3539_s7 + $0x18] sm:$0xff] }
 0x1e4   :  { %v730_v57 = vpop.f32.mrb[12].mxu1  ;;  %v1705_v58 = vpop.f32.mrb[22].mxu0 }
 0x1e5   :  { %v734_v59 = vadd.f32 %v730_v57, %v659_v54  ;;  %v2743_v60 = vpop.f32.mrb[13].mxu1  ;;  %v2808_v61 = vpop.f32.mrb[23].mxu0  ;;  %v2894_v57 = vpack.c.bf16 %v2127_v56, %v2126_v55 }
 0x1e8   :  { %v805_v62 = vpop.f32.mrb[14].mxu1  ;;  %v1855_v63 = vpop.f32.mrb[24].mxu0 }
 0x1e9   :  { %v809_v0 = vadd.f32 %v805_v62, %v734_v59  ;;  %v2748_v1 = vpop.f32.mrb[15].mxu1  ;;  %v2818_v2 = vpop.f32.mrb[25].mxu0  ;;  %v2211_v59 = vld [vmem:[%s3541_s9 + $0x8] sm:$0xff] }
 0x1ea   :  { %v2573_v1 = vld [vmem:[%s3537_s5] ss:$0 sm:$0xff] }
 0x1ec   :  { %v880_v4 = vpop.f32.mrb[16].mxu1  ;;  %v2005_v5 = vpop.f32.mrb[26].mxu0 }
 0x1ed   :  { %v884_v7 = vadd.f32 %v880_v4, %v809_v0  ;;  %v2753_v8 = vpop.f32.mrb[17].mxu1  ;;  %v2828_v9 = vpop.f32.mrb[27].mxu0  ;;  %v2574_v4 = vld [vmem:[%s3538_s6] ss:$0 sm:$0xff] }
 0x1ee   :  { %v2212_v8 = vld [vmem:[%s3541_s9 + $0x10] sm:$0xff]  ;;  %v2213_v9 = vld [vmem:[%s3541_s9 + $0x18] sm:$0xff] }
 0x1f0   :  { %v955_v10 = vpop.f32.mrb[18].mxu1 }
 0x1f1   :  { %v959_v11 = vadd.f32 %v955_v10, %v884_v7  ;;  %v2758_v12 = vpop.f32.mrb[19].mxu1  ;;  %v2900_v10 = vpack.c.bf16 %v2213_v9, %v2212_v8 }
 0x1f2   :  { %v2296_v12 = vld [vmem:[%s3543_s11 + $0x8] sm:$0xff] }
 0x1f4   :  { %v1030_v13 = vpop.f32.mrb[20].mxu1 }
 0x1f5   :  { %v1034_v14 = vadd.f32 %v1030_v13, %v959_v11  ;;  %v2763_v15 = vpop.f32.mrb[21].mxu1  ;;  %v2295_v11 = vld [vmem:[%s3543_s11] sm:$0xff] }
 0x1f6   :  { %v2903_v13 = vpack.c.bf16 %v2296_v12, %v2295_v11  ;;  %v2379_v15 = vld [vmem:[%s3545_s13] sm:$0xff] }
 0x1f7   :  { %v1109_v16 = vadd.f32 %v1105_v38, %v1034_v14  ;;  %v2575_v14 = vld [vmem:[%s3540_s8] ss:$0 sm:$0xff] }
 0x1f8   :  { %v1180_v17 = vpop.f32.mrb[22].mxu1 }
 0x1f9   :  { %v1184_v18 = vadd.f32 %v1180_v17, %v1109_v16  ;;  %v2773_v19 = vpop.f32.mrb[23].mxu1  ;;  %v2380_v16 = vld [vmem:[%s3545_s13 + $0x8] sm:$0xff] }
 0x1fb   :  { %v1259_v20 = vadd.f32 %v1255_v43, %v1184_v18 }
 0x1fc   :  { %v1330_v21 = vpop.f32.mrb[24].mxu1 }
 0x1fd   :  { %v1334_v22 = vadd.f32 %v1330_v21, %v1259_v20  ;;  %v2783_v23 = vpop.f32.mrb[25].mxu1  ;;  %v2909_v20 = vpack.c.bf16 %v2380_v16, %v2379_v15 }
 0x1fe   :  { %v2298_v23 = vld [vmem:[%s3543_s11 + $0x18] sm:$0xff] }
 0x1ff   :  { %v1409_v24 = vadd.f32 %v1405_v48, %v1334_v22  ;;  %v2297_v22 = vld [vmem:[%s3543_s11 + $0x10] sm:$0xff] }
 0x200   :  { %v1480_v25 = vpop.f32.mrb[26].mxu1 }
 0x201   :  { %v1484_v26 = vadd.f32 %v1480_v25, %v1409_v24  ;;  %v2793_v27 = vpop.f32.mrb[27].mxu1  ;;  %v2381_v24 = vld [vmem:[%s3545_s13 + $0x10] sm:$0xff]  ;;  %v2906_v25 = vpack.c.bf16 %v2298_v23, %v2297_v22 }
 0x203   :  { %v1559_v28 = vadd.f32 %v1555_v53, %v1484_v26  ;;  %v2125_v53 = vld [vmem:[%s3539_s7 + $0x8] sm:$0xff]  ;;  %v2382_v26 = vld [vmem:[%s3545_s13 + $0x18] sm:$0xff] }
 0x204   :  { %v1630_v29 = vpop.f32.mrb[28].mxu1  ;;  %v2891_v54 = vpack.c.bf16 %v2125_v53, %v2124_v52 }
 0x205   :  { %v1634_v30 = vadd.f32 %v1630_v29, %v1559_v28  ;;  %v2803_v31 = vpop.f32.mrb[29].mxu1 }
 0x206   :  { %2892 = vmatpush3.bf16.msra.mxu0 %v2891_v54  ;;  %v2579_v31 = vld [vmem:[%s3544_s12] ss:$0 sm:$0xff]  ;;  %s3005_s12 = smov [#allocation4]  }
 0x207   :  { %v1709_v32 = vadd.f32 %v1705_v58, %v1634_v30  ;;  %2893 = vmatprep.subr.bf16.mxu0 %v3002_v3  ;;  %v2210_v58 = vld [vmem:[%s3541_s9] sm:$0xff] }
 0x208   :  { %v1780_v33 = vpop.f32.mrb[30].mxu1  ;;  %v2897_v60 = vpack.c.bf16 %v2211_v59, %v2210_v58 }
 0x209   :  { %v1784_v34 = vadd.f32 %v1780_v33, %v1709_v32  ;;  %v2813_v35 = vpop.f32.mrb[31].mxu1  ;;  %v2581_v32 = vld [vmem:[%s3546_s14] ss:$0 sm:$0xff]  ;;  %s2510_s14 = sshll.u32 %s3005_s12, 4  ;;  %s2511_s14 = int_to_ptr.vmem [resolvable:$true] %s2510_s14 }
 0x20a   :  { %2895 = vmatpush3.bf16.msra.mxu0 %v2894_v57  ;;  %2898 = vmatpush3.bf16.msra.mxu1 %v2897_v60  ;;  %s2932_s4 = scalar_lea.vmem %s2511_s14, 32  ;;  %p2937_p1 = scmp.lt.s32.totalorder %s2511_s14, %s2511_s14 }
 0x20b   :  { %v1859_v36 = vadd.f32 %v1855_v63, %v1784_v34  ;;  %2902 = vmatprep.subr.bf16.mxu0 %v3002_v3  ;;  %2899 = vmatprep.subr.bf16.mxu1 %v3002_v3  ;;  %p2933_p0 = scmp.ne.s32.totalorder %s2511_s14, %s2932_s4  ;;  %p2938_p2 = scmp.lt.s32.totalorder %s2932_s4, %s2932_s4 }
 0x20c   :  { %v1930_v37 = vpop.f32.mrb[32].mxu1 }
 0x20d   :  { %v1934_v38 = vadd.f32 %v1930_v37, %v1859_v36  ;;  %v2823_v39 = vpop.f32.mrb[33].mxu1  ;;  %p2939_p3 = por %p2938_p2, %p2937_p1 }
 0x20e   :  { %2901 = vmatpush3.bf16.msra.mxu1 %v2900_v10  ;;  %v2466_v39 = vld [vmem:[%s3547_s15] sm:$0x3]  ;;  %s3006_s15 = smov [#allocation2]  }
 0x20f   :  { %v2009_v40 = vadd.f32 %v2005_v5, %v1934_v38  ;;  %2908 = vmatprep.subr.bf16.mxu1 %v3002_v3  ;;  %s2500_s2 = sshll.u32 %s3006_s15, 4  ;;  %p2940_p4 = pnand %p2939_p3, %p2933_p0  ;;  %s2501_s2 = int_to_ptr.vmem [resolvable:$true] %s2500_s2 }
 0x210   :  { %v2080_v41 = vpop.f32.mrb[34].mxu1 }
 0x211   :  { %v2084_v43 = vadd.f32 %v2080_v41, %v2009_v40  ;;  %v2833_v44 = vpop.f32.mrb[35].mxu1  ;;  %v2469_v41 = vmul.f32 -0.5, %v2466_v39 }
 0x213   :  { %v2092_v45 = vadd.f32 %v2572_v42, %v2084_v43 }
 0x215   :  { %v2094_v46 = vsel %vm2093_vm3, %v2092_v45, 0.0 }
 0x216   :  { %2095 = vadd.xlane.f32.xlu0 %v2094_v46 }
 0x2a3   :  { %v2096_v47 = vpop.xlane.xlu0 %2095 }
 0x2a4   :  { %v2098_v48 = vmul.f32 0.03125, %v2096_v47 }
 0x2a6   :  { %v2099_v49 = vsub.f32 %v2092_v45, %v2098_v48  ;;  %v2470_v45 = vmul.f32 %v2469_v41, %v2466_v39 }
 0x2a8   :  { %v2100_v50 = vmul.f32 %v2099_v49, %v2099_v49 }
 0x2aa   :  { %v2101_v51 = vsel %vm2093_vm3, %v2100_v50, 0.0 }
 0x2ab   :  { %2102 = vadd.xlane.f32.xlu0 %v2101_v51 }
 0x338   :  { %v2103_v61 = vpop.xlane.xlu0 %2102 }
 0x339   :  { %v2104_v62 = vmul.f32 0.03125, %v2103_v61 }
 0x33b   :  { %v2105_v63 = vadd.f32 1e-05, %v2104_v62 }
 0x33d   :  { %2920 = vrsqrt.f32 %v2105_v63 }
 0x347   :  { %v2921_v0 = vpop.eup %2920 }
 0x348   :  { %v2107_v2 = vmul.f32 %v2921_v0, %v2099_v49 }
 0x34a   :  { %v2115_v5 = vmul.f32 %v2573_v1, %v2107_v2 }
 0x34c   :  { %v2123_v7 = vadd.f32 %v2574_v4, %v2115_v5 }
 0x34e   :  { %2843 = vmatmul.mubr.msk.f32.vlgmr.msra.gmra.mrb[28].mxu0 %vm2135_vm4, %v2123_v7 }
 0x34f   :  { %2864 = vmatprep.mubr.msk.f32.mxu0 %vm3003_vm0, %v3004_v6  ;;  %2904 = vmatpush3.bf16.msra.mxu0 %v2903_v13 }
 0x350   :  { %2905 = vmatprep.subr.bf16.mxu0 %v3002_v3 }
 0x353   :  { %2907 = vmatpush3.bf16.msra.mxu0 %v2906_v25 }
 0x421   :  { %v2205_v17 = vpop.f32.mrb[28].mxu0 }
 0x422   :  { %v2206_v18 = vadd.f32 %v2575_v14, %v2205_v17  ;;  %v2844_v19 = vpop.f32.mrb[29].mxu0 }
 0x424   :  { %v2209_v21 = vmax.f32 %v2206_v18, 0.0 }
 0x426   :  { %2854 = vmatmul.mubr.msk.f32.vlgmr.msra.gmra.mrb[36].mxu1 %vm2135_vm4, %v2209_v21 }
 0x427   :  { %2910 = vmatpush3.bf16.msra.mxu1 %v2909_v20  ;;  %2875 = vmatprep.mubr.msk.f32.mxu1 %vm3003_vm0, %v3004_v6  ;;  %v2912_v6 = vpack.c.bf16 %v2382_v26, %v2381_v24 }
 0x428   :  { %2911 = vmatprep.subr.bf16.mxu1 %v3002_v3  ;;  %v2577_v3 = vld [vmem:[%s3542_s10] ss:$0 sm:$0xff] }
 0x42b   :  { %2913 = vmatpush3.bf16.msra.mxu1 %v2912_v6 }
 0x4f9   :  { %v2290_v27 = vpop.f32.mrb[36].mxu1 }
 0x4fa   :  { %v2291_v28 = vadd.f32 %v2577_v3, %v2290_v27  ;;  %v2855_v29 = vpop.f32.mrb[37].mxu1 }
 0x4fc   :  { %v2294_v30 = vmax.f32 %v2291_v28, 0.0 }
 0x4fe   :  { %2865 = vmatmul.mubr.msk.f32.vlgmr.msra.gmra.mrb[30].mxu0 %vm2135_vm4, %v2294_v30  ;;  %2876 = vmatmul.mubr.msk.f32.vlgmr.msra.gmra.mrb[38].mxu1 %vm2135_vm4, %v2294_v30 }
 0x5d1   :  { %v2375_v33 = vpop.f32.mrb[30].mxu0  ;;  %v2456_v34 = vpop.f32.mrb[38].mxu1 }
 0x5d2   :  { %v2376_v35 = vadd.f32 %v2579_v31, %v2375_v33  ;;  %v2457_v36 = vadd.f32 %v2581_v32, %v2456_v34  ;;  %v2866_v37 = vpop.f32.mrb[31].mxu0  ;;  %v2877_v38 = vpop.f32.mrb[39].mxu1 }
 0x5d4   :  { %2922 = vtanh.f32 %v2376_v35 }
 0x5d5   :  { %2924 = vtanh.f32 %v2457_v36 }
 0x5de   :  { %v2923_v40 = vpop.eup %2922 }
 0x5df   :  { %v2925_v42 = vpop.eup %2924  ;;  %2489 = vst.msk [vmem:[#allocation2] sm:$0x3] %vm2472_vm5, %v2923_v40 }
 0x5e0   :  { %v2461_v43 = vadd.f32 1.0, %v2925_v42 }
 0x5e2   :  { %v2462_v44 = vmul.f32 6.0, %v2461_v43 }
 0x5e4   :  { %v2463_v46 = vadd.f32 -10.0, %v2462_v44 }
 0x5e6   :  { %v2464_v47 = vmul.f32 1.442695, %v2463_v46  ;;  %v2471_v48 = vsub.f32 %v2470_v45, %v2463_v46  ;;  %2493 = vst.msk [vmem:[#allocation6] sm:$0x3] %vm2472_vm5, %v2463_v46 }
 0x5e8   :  { %2926 = vpow2.f32 %v2464_v47  ;;  %v2473_v49 = vsel %vm2472_vm5, %v2471_v48, 0.0 }
 0x5e9   :  { %2474 = vadd.xlane.f32.xlu1 %v2473_v49 }
 0x5f2   :  { %v2927_v50 = vpop.eup %2926 }
 0x5f3   :  { %v2467_v51 = vmul.f32 %v2927_v50, %v2466_v39 }
 0x5f5   :  { %v2468_v52 = vadd.f32 %v2467_v51, %v2376_v35 }
 0x5f7   :  { %2928 = vtanh.f32 %v2468_v52 }
 0x601   :  { %v2929_v53 = vpop.eup %2928 }
 0x602   :  { %2490 = vst.msk [vmem:[#allocation4] sm:$0x3] %vm2472_vm5, %v2929_v53  ;;  %v2479_v54 = vmul.f32 %v2929_v53, %v2929_v53 }
 0x604   :  { %v2480_v55 = vsub.f32 1.0, %v2479_v54 }
 0x606   :  { %v2481_v56 = vmax.f32 %v2480_v55, 0.0 }
 0x608   :  { %v2482_v57 = vadd.f32 1e-06, %v2481_v56 }
 0x60a   :  { %2930 = vlog2.f32 %v2482_v57 }
 0x614   :  { %v2931_v58 = vpop.eup %2930 }
 0x615   :  { %v2484_v59 = vmul.f32 0.6931472, %v2931_v58 }
 0x617   :  { %v2485_v60 = vsel %vm2472_vm5, %v2484_v59, 0.0 }
 0x618   :  { %2486 = vadd.xlane.f32.xlu1 %v2485_v60 }
 0x619   :  { %2943 = shalt.err (!%p2940_p4)
}
 0x61a   :  { %s2944_s9 = scalar_lea.hbm %s3549_s17, 32 }
 0x61b   :  { %p2945_p5 = scmp.ne.s32.totalorder %s3549_s17, %s2944_s9  ;;  %p2948_p6 = scmp.lt.u32.totalorder %s2944_s9, %s3549_s17 }
 0x61d   :  { %p2950_p7 = pnand %p2948_p6, %p2945_p5 }
 0x61f   :  { %2953 = shalt.err (!%p2950_p7)
}
 0x620   :  { %2513 = dma.vmem_to_hbm [thread:$0]  %s2511_s14, 32, %s3549_s17, [#allocation5]  }
 0x621   :  { %s2954_s7 = scalar_lea.vmem %s2501_s2, 32  ;;  %p2959_p9 = scmp.lt.s32.totalorder %s2501_s2, %s2501_s2 }
 0x622   :  { %p2955_p8 = scmp.ne.s32.totalorder %s2501_s2, %s2954_s7  ;;  %p2960_p10 = scmp.lt.s32.totalorder %s2954_s7, %s2954_s7 }
 0x624   :  { %p2961_p11 = por %p2960_p10, %p2959_p9 }
 0x626   :  { %p2962_p12 = pnand %p2961_p11, %p2955_p8 }
 0x628   :  { %2965 = shalt.err (!%p2962_p12)
}
 0x629   :  { %s2966_s24 = scalar_lea.hbm %s3548_s16, 32 }
 0x62a   :  { %p2967_p13 = scmp.ne.s32.totalorder %s3548_s16, %s2966_s24  ;;  %p2970_p0 = scmp.lt.u32.totalorder %s2966_s24, %s3548_s16 }
 0x62c   :  { %p2972_p1 = pnand %p2970_p0, %p2967_p13 }
 0x62e   :  { %2975 = shalt.err (!%p2972_p1)
}
 0x62f   :  { %2503 = dma.vmem_to_hbm [thread:$0]  %s2501_s2, 32, %s3548_s16, [#allocation3]  }
 0x630   :  { %s3007_s13 = smov [#allocation6]  }
 0x631   :  { %s2522_s5 = sshll.u32 %s3007_s13, 4  ;;  %s2523_s5 = int_to_ptr.vmem [resolvable:$true] %s2522_s5 }
 0x632   :  { %s2976_s10 = scalar_lea.vmem %s2523_s5, 32  ;;  %p2981_p3 = scmp.lt.s32.totalorder %s2523_s5, %s2523_s5 }
 0x633   :  { %p2977_p2 = scmp.ne.s32.totalorder %s2523_s5, %s2976_s10  ;;  %p2982_p4 = scmp.lt.s32.totalorder %s2976_s10, %s2976_s10 }
 0x635   :  { %p2983_p5 = por %p2982_p4, %p2981_p3 }
 0x637   :  { %p2984_p6 = pnand %p2983_p5, %p2977_p2 }
 0x639   :  { %2987 = shalt.err (!%p2984_p6)
}
 0x63a   :  { %s2988_s14 = scalar_lea.hbm %s3551_s19, 32 }
 0x63b   :  { %p2989_p7 = scmp.ne.s32.totalorder %s3551_s19, %s2988_s14  ;;  %p2992_p8 = scmp.lt.u32.totalorder %s2988_s14, %s3551_s19 }
 0x63d   :  { %p2994_p9 = pnand %p2992_p8, %p2989_p7 }
 0x63f   :  { %2997 = shalt.err (!%p2994_p9)
}
 0x640   :  { %2525 = dma.vmem_to_hbm [thread:$0]  %s2523_s5, 32, %s3551_s19, [#allocation5]   ;;  %vm2491_vm6 = vcmask 1024  }
 0x676   :  { %v2475_v61 = vpop.xlane.xlu1 %2474 }
 0x677   :  { %v2583_v62 = vadd.f32 -3.675754, %v2475_v61 }
 0x6a5   :  { %v2487_v63 = vpop.xlane.xlu1 %2486 }
 0x6a6   :  { %v2488_v0 = vsub.f32 %v2583_v62, %v2487_v63 }
 0x6a8   :  { %2492 = vst.msk [vmem:[%s3550_s18] sm:$0x3] %vm2491_vm6, %v2488_v0 }
 0x6a9   :  { %2998 = dma.done.wait [#allocation3], 32  }
 0x6aa   :  { %2999 = vsyncadd [#allocation3], 4294967264 }
 0x6ab   :  { %3000 = dma.done.wait [#allocation5], 64  }
 0x6ac   :  { %3001 = vsyncadd [#allocation5], 4294967232 }
 0x6ad   :  { %2537 = vsyncpa [#allocation3], 1 }
 0x6ae   :  { %2538 = vsyncpa [#allocation5], 1 }

</bundles_post_ra>
